<compile_context>
chip_gen: v5e
topology: v5e:2x2
jax: 0.10.0
libtpu: 0.0.40
codegen_flags: <defaults>
</compile_context>

<pallas_src>
import jax
import jax.numpy as jnp
from jax.experimental import pallas as pl
from jax.experimental.pallas import tpu as pltpu


def up_conv_kernel(x_ref, w_ref, shift_ref, o_ref):
    """Fused per-phase sub-pixel conv + affine + ReLU for one (batch, row-tile).

    x_ref     : (1, H+2, W+2, Cin)   zero-padded original-res input (bf16)
    w_ref     : (16, Cin, Cout)      per-phase 2x2 stencil weights (bf16),
                                     index k = ((di*2+dj)*2+s)*2+t
    shift_ref : (1, 2*Cout)          fused conv-bias + BN shift (f32), dj-major
    o_ref     : (1, TH, 2, W, 2*Cout) output row tile; dim-2 index = di
    """
    TH = o_ref.shape[1]
    W = o_ref.shape[3]
    C2 = o_ref.shape[4]            # 2 * Cout
    Cout = C2 // 2
    Cin = x_ref.shape[3]
    M = TH * W

    t = pl.program_id(1)
    row0 = pl.multiple_of(t * TH, TH)   # first padded input row of this tile

    # f32 accumulators per output phase (di, dj)
    acc = [[jnp.zeros((M, Cout), jnp.float32) for _ in range(2)]
           for _ in range(2)]

    # (di, s) row-tap pairs that read padded-row band r = di + s
    pairs = {0: ((0, 0),), 1: ((0, 1), (1, 0)), 2: ((1, 1),)}

    for r in range(3):
        xr = x_ref[0, pl.ds(row0 + r, TH), :, :]            # (TH, W+2, Cin)
        # hoist the 3 shifted column views once per row band; flatten M = TH*W
        cols = [xr[:, b:b + W, :].reshape(M, Cin) for b in range(3)]
        for (di, s) in pairs[r]:
            for dj in range(2):
                for tt in range(2):
                    k = ((di * 2 + dj) * 2 + s) * 2 + tt
                    acc[di][dj] += jax.lax.dot_general(
                        cols[dj + tt], w_ref[k],
                        dimension_numbers=(((1,), (0,)), ((), ())),
                        preferred_element_type=jnp.float32)

    shift = shift_ref[0]                                    # (2*Cout,) f32
    for di in range(2):
        y = jnp.concatenate([acc[di][0], acc[di][1]], axis=-1) + shift
        y = jnp.maximum(y, 0.0).astype(o_ref.dtype)
        o_ref[0, :, di, :, :] = y.reshape(TH, W, C2)


def _fold_params(w_hwio, bias, gamma, beta, run_mean, run_var, eps,
                 compute_dtype):
    """Per-phase 2x2 stencil weights (16, Cin, Cout) with BN scale folded in,
    plus the per-channel shift (1, 2*Cout) (dj-major)."""
    KH, KW, Cin, Cout = w_hwio.shape
    assert (KH, KW) == (3, 3)
    inv_std = 1.0 / jnp.sqrt(run_var + eps)
    scale = gamma * inv_std                                   # (Cout,)
    shift = beta + (bias - run_mean) * scale                  # (Cout,)
    w_s = w_hwio.astype(jnp.float32) * scale                  # BN scale folded

    # upsample(x2, nearest) + conv3x3(pad=1): output phase (di, dj) only sees a
    # 2x2 window of original pixels.  Row-tap s of phase di collects kernel
    # rows groups[di][s]; columns identically with dj / t.
    groups = {0: ([0], [1, 2]), 1: ([0, 1], [2])}
    wp = jnp.zeros((2, 2, 2, 2, Cin, Cout), jnp.float32)
    for di in range(2):
        for dj in range(2):
            for s in range(2):
                for t in range(2):
                    wsum = sum(w_s[kh, kw]
                               for kh in groups[di][s]
                               for kw in groups[dj][t])
                    wp = wp.at[di, dj, s, t].set(wsum)
    wp = wp.reshape(16, Cin, Cout).astype(compute_dtype)
    shift2 = jnp.tile(shift, 2).reshape(1, 2 * Cout).astype(jnp.float32)
    return wp, shift2


def _pick_row_tile(H, max_tile=32, min_tiles=4):
    """Largest divisor of H that is <= max_tile and (when possible) leaves at
    least `min_tiles` row tiles per image for DMA/compute overlap."""
    divisors = [d for d in range(1, H + 1) if H % d == 0]
    good = [d for d in divisors if d <= max_tile and H // d >= min_tiles]
    if good:
        return max(good)
    ok = [d for d in divisors if d <= max_tile]
    return max(ok) if ok else H


def _vmem_limit_bytes(frac=0.85, fallback=64 * 1024 * 1024):
    """Generation-aware VMEM budget (~85% of capacity)."""
    try:
        cap = int(pltpu.get_tpu_info().vmem_capacity_bytes)
        return int(cap * frac)
    except Exception:
        return fallback


def up_conv_forward_nhwc(x_nhwc, w_hwio, bias, gamma, beta, run_mean, run_var,
                         eps=1e-5, compute_dtype=jnp.bfloat16,
                         out_dtype=jnp.float32):
    """NHWC in -> NHWC out (preferred entry point: no layout transposes)."""
    N, H, W, Cin = x_nhwc.shape
    Cout = w_hwio.shape[3]
    wp, shift2 = _fold_params(w_hwio, bias, gamma, beta, run_mean, run_var,
                              eps, compute_dtype)

    # conv padding=1 applied at ORIGINAL resolution only (small tensor);
    # bf16 cast halves input HBM traffic (accumulation stays f32 in-kernel).
    xpad = jnp.pad(x_nhwc, ((0, 0), (1, 1), (1, 1), (0, 0))).astype(
        compute_dtype)

    TH = _pick_row_tile(H)
    nT = H // TH

    out = pl.pallas_call(
        up_conv_kernel,
        out_shape=jax.ShapeDtypeStruct((N, H, 2, W, 2 * Cout), out_dtype),
        grid_spec=pltpu.PrefetchScalarGridSpec(
            num_scalar_prefetch=0,
            grid=(N, nT),
            in_specs=[
                # full padded image, resident across all row tiles of a batch
                pl.BlockSpec((1, H + 2, W + 2, Cin), lambda n, t: (n, 0, 0, 0)),
                pl.BlockSpec((16, Cin, Cout), lambda n, t: (0, 0, 0)),
                pl.BlockSpec((1, 2 * Cout), lambda n, t: (0, 0)),
            ],
            out_specs=pl.BlockSpec((1, TH, 2, W, 2 * Cout),
                                   lambda n, t: (n, t, 0, 0, 0)),
        ),
        compiler_params=pltpu.CompilerParams(
            # only batch is megacore-sharded so cores never duplicate the
            # full-image DMA (relevant on v7x; no-op on single-TC v5e/v6e)
            dimension_semantics=("parallel", "arbitrary"),
            vmem_limit_bytes=_vmem_limit_bytes()),
    )(xpad, wp, shift2)

    # (N, H, 2, W, 2*Cout) row-major == (N, 2H, 2W, Cout): free reshape.
    return out.reshape(N, 2 * H, 2 * W, Cout)


def up_conv_forward(x_nchw, w_hwio, bias, gamma, beta, run_mean, run_var,
                    eps=1e-5):
    """PyTorch-compatible NCHW in -> NCHW out adapter (callers that can consume
    NHWC should use up_conv_forward_nhwc directly and skip both transposes)."""
    x_nhwc = jnp.transpose(x_nchw, (0, 2, 3, 1))   # small original-res tensor
    out = up_conv_forward_nhwc(x_nhwc, w_hwio, bias, gamma, beta,
                               run_mean, run_var, eps)
    return jnp.transpose(out, (0, 3, 1, 2))


def ref_forward(x_nchw, w_hwio, bias, gamma, beta, run_mean, run_var,
                eps=1e-5):
    """Pure-JAX f32 reference (nearest upsample + conv + eval-mode BN + ReLU)."""
    x = jnp.repeat(jnp.repeat(x_nchw, 2, axis=2), 2, axis=3)
    y = jax.lax.conv_general_dilated(
        x, w_hwio, window_strides=(1, 1), padding=((1, 1), (1, 1)),
        dimension_numbers=("NCHW", "HWIO", "NCHW"))
    y = y + bias.reshape(1, -1, 1, 1)
    y = (y - run_mean.reshape(1, -1, 1, 1)) \
        / jnp.sqrt(run_var.reshape(1, -1, 1, 1) + eps)
    y = y * gamma.reshape(1, -1, 1, 1) + beta.reshape(1, -1, 1, 1)
    return jnp.maximum(y, 0.0)


if __name__ == "__main__":
    # small shapes consistent with the module: batch=2, ch_in=4, ch_out=8, 16x16
    N, CIN, COUT, H, W = 2, 4, 8, 16, 16

    key = jax.random.PRNGKey(0)
    kx, kw, kb, kg, kbt, km, kv = jax.random.split(key, 7)

    x = jax.random.normal(kx, (N, CIN, H, W), jnp.float32)

    # deterministic, synthetic parameters (same shapes as the torch module)
    w = 0.1 * jax.random.normal(kw, (3, 3, CIN, COUT), jnp.float32)   # HWIO
    bias = 0.1 * jax.random.normal(kb, (COUT,), jnp.float32)
    gamma = 1.0 + 0.1 * jax.random.normal(kg, (COUT,), jnp.float32)
    beta = 0.1 * jax.random.normal(kbt, (COUT,), jnp.float32)
    run_mean = 0.1 * jax.random.normal(km, (COUT,), jnp.float32)
    run_var = 1.0 + 0.1 * jax.nn.softplus(
        jax.random.normal(kv, (COUT,), jnp.float32))

    fwd = jax.jit(up_conv_forward)
    out = jax.block_until_ready(fwd(x, w, bias, gamma, beta, run_mean, run_var))

    ref = ref_forward(x, w, bias, gamma, beta, run_mean, run_var)
    assert out.shape == (N, COUT, 2 * H, 2 * W), out.shape
    err = float(jnp.max(jnp.abs(out - ref)))
    # bf16 inputs/weights (f32 accumulation) -> loosened tolerance vs f32 ref
    assert jnp.allclose(out, ref, atol=3e-2, rtol=3e-2), err

    print("KERNEL_OK")
</pallas_src>

<mosaic_0001>
module attributes {stable_mosaic.version = 11 : i64} {
  func.func @up_conv_kernel(%arg0: i32, %arg1: i32, %arg2: memref<1x18x18x4xbf16, #tpu.memory_space<vmem>>, %arg3: memref<16x4x8xbf16, #tpu.memory_space<vmem>>, %arg4: memref<1x16xf32, #tpu.memory_space<vmem>>, %arg5: memref<1x4x2x16x16xf32, #tpu.memory_space<vmem>>) attributes {dimension_semantics = [#tpu.dimension_semantics<parallel>, #tpu.dimension_semantics<arbitrary>], iteration_bounds = array<i64: 2, 4>, scalar_prefetch = 0 : i64, scratch_operands = 0 : i64, tpu.core_type = #tpu.core_type<tc>, window_params = [{transform_indices = @transform_0, window_bounds = array<i64: 1, 18, 18, 4>}, {pipeline_mode = #tpu.pipeline_mode<synchronous>, transform_indices = @transform_1, window_bounds = array<i64: 16, 4, 8>}, {pipeline_mode = #tpu.pipeline_mode<synchronous>, transform_indices = @transform_2, window_bounds = array<i64: 1, 16>}, {transform_indices = @transform_3, window_bounds = array<i64: 1, 4, 2, 16, 16>}]} {
    %c4_i32 = arith.constant 4 : i32
    %0 = arith.muli %arg1, %c4_i32 : i32
    %1 = tpu.assume_multiple %0, 4 : i32
    %cst = arith.constant 0.000000e+00 : f32
    %2 = vector.broadcast %cst : f32 to vector<64x8xf32>
    %cst_0 = arith.constant 0.000000e+00 : f32
    %3 = vector.broadcast %cst_0 : f32 to vector<64x8xf32>
    %cst_1 = arith.constant 0.000000e+00 : f32
    %4 = vector.broadcast %cst_1 : f32 to vector<64x8xf32>
    %cst_2 = arith.constant 0.000000e+00 : f32
    %5 = vector.broadcast %cst_2 : f32 to vector<64x8xf32>
    %c0_i32 = arith.constant 0 : i32
    %6 = arith.addi %1, %c0_i32 : i32
    %c0 = arith.constant 0 : index
    %7 = arith.index_cast %6 : i32 to index
    %c0_3 = arith.constant 0 : index
    %c0_4 = arith.constant 0 : index
    %8 = vector.load %arg2[%c0, %7, %c0_3, %c0_4] : memref<1x18x18x4xbf16, #tpu.memory_space<vmem>>, vector<1x4x18x4xbf16>
    %9 = vector.shape_cast %8 : vector<1x4x18x4xbf16> to vector<4x18x4xbf16>
    %10 = vector.extract_strided_slice %9 {offsets = [0, 0, 0], sizes = [4, 16, 4], strides = [1, 1, 1]} : vector<4x18x4xbf16> to vector<4x16x4xbf16>
    %11 = vector.shape_cast %10 : vector<4x16x4xbf16> to vector<64x4xbf16>
    %12 = vector.extract_strided_slice %9 {offsets = [0, 1, 0], sizes = [4, 16, 4], strides = [1, 1, 1]} : vector<4x18x4xbf16> to vector<4x16x4xbf16>
    %13 = vector.shape_cast %12 : vector<4x16x4xbf16> to vector<64x4xbf16>
    %14 = vector.extract_strided_slice %9 {offsets = [0, 2, 0], sizes = [4, 16, 4], strides = [1, 1, 1]} : vector<4x18x4xbf16> to vector<4x16x4xbf16>
    %15 = vector.shape_cast %14 : vector<4x16x4xbf16> to vector<64x4xbf16>
    %c0_5 = arith.constant 0 : index
    %c0_6 = arith.constant 0 : index
    %c0_7 = arith.constant 0 : index
    %16 = vector.load %arg3[%c0_5, %c0_6, %c0_7] : memref<16x4x8xbf16, #tpu.memory_space<vmem>>, vector<1x4x8xbf16>
    %17 = vector.shape_cast %16 : vector<1x4x8xbf16> to vector<4x8xbf16>
    %cst_8 = arith.constant dense<0.000000e+00> : vector<64x8xf32>
    %18 = tpu.matmul %11, %17, %cst_8 {dimension_numbers = #tpu.dot_dimension_numbers<[1], [0], [0], [1], [0, 0, 1, 1], [], []>} : vector<64x4xbf16>, vector<4x8xbf16>, vector<64x8xf32> -> vector<64x8xf32>
    %19 = arith.addf %2, %18 : vector<64x8xf32>
    %c1 = arith.constant 1 : index
    %c0_9 = arith.constant 0 : index
    %c0_10 = arith.constant 0 : index
    %20 = vector.load %arg3[%c1, %c0_9, %c0_10] : memref<16x4x8xbf16, #tpu.memory_space<vmem>>, vector<1x4x8xbf16>
    %21 = vector.shape_cast %20 : vector<1x4x8xbf16> to vector<4x8xbf16>
    %cst_11 = arith.constant dense<0.000000e+00> : vector<64x8xf32>
    %22 = tpu.matmul %13, %21, %cst_11 {dimension_numbers = #tpu.dot_dimension_numbers<[1], [0], [0], [1], [0, 0, 1, 1], [], []>} : vector<64x4xbf16>, vector<4x8xbf16>, vector<64x8xf32> -> vector<64x8xf32>
    %23 = arith.addf %19, %22 : vector<64x8xf32>
    %c4 = arith.constant 4 : index
    %c0_12 = arith.constant 0 : index
    %c0_13 = arith.constant 0 : index
    %24 = vector.load %arg3[%c4, %c0_12, %c0_13] : memref<16x4x8xbf16, #tpu.memory_space<vmem>>, vector<1x4x8xbf16>
    %25 = vector.shape_cast %24 : vector<1x4x8xbf16> to vector<4x8xbf16>
    %cst_14 = arith.constant dense<0.000000e+00> : vector<64x8xf32>
    %26 = tpu.matmul %13, %25, %cst_14 {dimension_numbers = #tpu.dot_dimension_numbers<[1], [0], [0], [1], [0, 0, 1, 1], [], []>} : vector<64x4xbf16>, vector<4x8xbf16>, vector<64x8xf32> -> vector<64x8xf32>
    %27 = arith.addf %3, %26 : vector<64x8xf32>
    %c5 = arith.constant 5 : index
    %c0_15 = arith.constant 0 : index
    %c0_16 = arith.constant 0 : index
    %28 = vector.load %arg3[%c5, %c0_15, %c0_16] : memref<16x4x8xbf16, #tpu.memory_space<vmem>>, vector<1x4x8xbf16>
    %29 = vector.shape_cast %28 : vector<1x4x8xbf16> to vector<4x8xbf16>
    %cst_17 = arith.constant dense<0.000000e+00> : vector<64x8xf32>
    %30 = tpu.matmul %15, %29, %cst_17 {dimension_numbers = #tpu.dot_dimension_numbers<[1], [0], [0], [1], [0, 0, 1, 1], [], []>} : vector<64x4xbf16>, vector<4x8xbf16>, vector<64x8xf32> -> vector<64x8xf32>
    %31 = arith.addf %27, %30 : vector<64x8xf32>
    %c1_i32 = arith.constant 1 : i32
    %32 = arith.addi %1, %c1_i32 : i32
    %c0_18 = arith.constant 0 : index
    %33 = arith.index_cast %32 : i32 to index
    %c0_19 = arith.constant 0 : index
    %c0_20 = arith.constant 0 : index
    %34 = vector.load %arg2[%c0_18, %33, %c0_19, %c0_20] : memref<1x18x18x4xbf16, #tpu.memory_space<vmem>>, vector<1x4x18x4xbf16>
    %35 = vector.shape_cast %34 : vector<1x4x18x4xbf16> to vector<4x18x4xbf16>
    %36 = vector.extract_strided_slice %35 {offsets = [0, 0, 0], sizes = [4, 16, 4], strides = [1, 1, 1]} : vector<4x18x4xbf16> to vector<4x16x4xbf16>
    %37 = vector.shape_cast %36 : vector<4x16x4xbf16> to vector<64x4xbf16>
    %38 = vector.extract_strided_slice %35 {offsets = [0, 1, 0], sizes = [4, 16, 4], strides = [1, 1, 1]} : vector<4x18x4xbf16> to vector<4x16x4xbf16>
    %39 = vector.shape_cast %38 : vector<4x16x4xbf16> to vector<64x4xbf16>
    %40 = vector.extract_strided_slice %35 {offsets = [0, 2, 0], sizes = [4, 16, 4], strides = [1, 1, 1]} : vector<4x18x4xbf16> to vector<4x16x4xbf16>
    %41 = vector.shape_cast %40 : vector<4x16x4xbf16> to vector<64x4xbf16>
    %c2 = arith.constant 2 : index
    %c0_21 = arith.constant 0 : index
    %c0_22 = arith.constant 0 : index
    %42 = vector.load %arg3[%c2, %c0_21, %c0_22] : memref<16x4x8xbf16, #tpu.memory_space<vmem>>, vector<1x4x8xbf16>
    %43 = vector.shape_cast %42 : vector<1x4x8xbf16> to vector<4x8xbf16>
    %cst_23 = arith.constant dense<0.000000e+00> : vector<64x8xf32>
    %44 = tpu.matmul %37, %43, %cst_23 {dimension_numbers = #tpu.dot_dimension_numbers<[1], [0], [0], [1], [0, 0, 1, 1], [], []>} : vector<64x4xbf16>, vector<4x8xbf16>, vector<64x8xf32> -> vector<64x8xf32>
    %45 = arith.addf %23, %44 : vector<64x8xf32>
    %c3 = arith.constant 3 : index
    %c0_24 = arith.constant 0 : index
    %c0_25 = arith.constant 0 : index
    %46 = vector.load %arg3[%c3, %c0_24, %c0_25] : memref<16x4x8xbf16, #tpu.memory_space<vmem>>, vector<1x4x8xbf16>
    %47 = vector.shape_cast %46 : vector<1x4x8xbf16> to vector<4x8xbf16>
    %cst_26 = arith.constant dense<0.000000e+00> : vector<64x8xf32>
    %48 = tpu.matmul %39, %47, %cst_26 {dimension_numbers = #tpu.dot_dimension_numbers<[1], [0], [0], [1], [0, 0, 1, 1], [], []>} : vector<64x4xbf16>, vector<4x8xbf16>, vector<64x8xf32> -> vector<64x8xf32>
    %49 = arith.addf %45, %48 : vector<64x8xf32>
    %c6 = arith.constant 6 : index
    %c0_27 = arith.constant 0 : index
    %c0_28 = arith.constant 0 : index
    %50 = vector.load %arg3[%c6, %c0_27, %c0_28] : memref<16x4x8xbf16, #tpu.memory_space<vmem>>, vector<1x4x8xbf16>
    %51 = vector.shape_cast %50 : vector<1x4x8xbf16> to vector<4x8xbf16>
    %cst_29 = arith.constant dense<0.000000e+00> : vector<64x8xf32>
    %52 = tpu.matmul %39, %51, %cst_29 {dimension_numbers = #tpu.dot_dimension_numbers<[1], [0], [0], [1], [0, 0, 1, 1], [], []>} : vector<64x4xbf16>, vector<4x8xbf16>, vector<64x8xf32> -> vector<64x8xf32>
    %53 = arith.addf %31, %52 : vector<64x8xf32>
    %c7 = arith.constant 7 : index
    %c0_30 = arith.constant 0 : index
    %c0_31 = arith.constant 0 : index
    %54 = vector.load %arg3[%c7, %c0_30, %c0_31] : memref<16x4x8xbf16, #tpu.memory_space<vmem>>, vector<1x4x8xbf16>
    %55 = vector.shape_cast %54 : vector<1x4x8xbf16> to vector<4x8xbf16>
    %cst_32 = arith.constant dense<0.000000e+00> : vector<64x8xf32>
    %56 = tpu.matmul %41, %55, %cst_32 {dimension_numbers = #tpu.dot_dimension_numbers<[1], [0], [0], [1], [0, 0, 1, 1], [], []>} : vector<64x4xbf16>, vector<4x8xbf16>, vector<64x8xf32> -> vector<64x8xf32>
    %57 = arith.addf %53, %56 : vector<64x8xf32>
    %c8 = arith.constant 8 : index
    %c0_33 = arith.constant 0 : index
    %c0_34 = arith.constant 0 : index
    %58 = vector.load %arg3[%c8, %c0_33, %c0_34] : memref<16x4x8xbf16, #tpu.memory_space<vmem>>, vector<1x4x8xbf16>
    %59 = vector.shape_cast %58 : vector<1x4x8xbf16> to vector<4x8xbf16>
    %cst_35 = arith.constant dense<0.000000e+00> : vector<64x8xf32>
    %60 = tpu.matmul %37, %59, %cst_35 {dimension_numbers = #tpu.dot_dimension_numbers<[1], [0], [0], [1], [0, 0, 1, 1], [], []>} : vector<64x4xbf16>, vector<4x8xbf16>, vector<64x8xf32> -> vector<64x8xf32>
    %61 = arith.addf %4, %60 : vector<64x8xf32>
    %c9 = arith.constant 9 : index
    %c0_36 = arith.constant 0 : index
    %c0_37 = arith.constant 0 : index
    %62 = vector.load %arg3[%c9, %c0_36, %c0_37] : memref<16x4x8xbf16, #tpu.memory_space<vmem>>, vector<1x4x8xbf16>
    %63 = vector.shape_cast %62 : vector<1x4x8xbf16> to vector<4x8xbf16>
    %cst_38 = arith.constant dense<0.000000e+00> : vector<64x8xf32>
    %64 = tpu.matmul %39, %63, %cst_38 {dimension_numbers = #tpu.dot_dimension_numbers<[1], [0], [0], [1], [0, 0, 1, 1], [], []>} : vector<64x4xbf16>, vector<4x8xbf16>, vector<64x8xf32> -> vector<64x8xf32>
    %65 = arith.addf %61, %64 : vector<64x8xf32>
    %c12 = arith.constant 12 : index
    %c0_39 = arith.constant 0 : index
    %c0_40 = arith.constant 0 : index
    %66 = vector.load %arg3[%c12, %c0_39, %c0_40] : memref<16x4x8xbf16, #tpu.memory_space<vmem>>, vector<1x4x8xbf16>
    %67 = vector.shape_cast %66 : vector<1x4x8xbf16> to vector<4x8xbf16>
    %cst_41 = arith.constant dense<0.000000e+00> : vector<64x8xf32>
    %68 = tpu.matmul %39, %67, %cst_41 {dimension_numbers = #tpu.dot_dimension_numbers<[1], [0], [0], [1], [0, 0, 1, 1], [], []>} : vector<64x4xbf16>, vector<4x8xbf16>, vector<64x8xf32> -> vector<64x8xf32>
    %69 = arith.addf %5, %68 : vector<64x8xf32>
    %c13 = arith.constant 13 : index
    %c0_42 = arith.constant 0 : index
    %c0_43 = arith.constant 0 : index
    %70 = vector.load %arg3[%c13, %c0_42, %c0_43] : memref<16x4x8xbf16, #tpu.memory_space<vmem>>, vector<1x4x8xbf16>
    %71 = vector.shape_cast %70 : vector<1x4x8xbf16> to vector<4x8xbf16>
    %cst_44 = arith.constant dense<0.000000e+00> : vector<64x8xf32>
    %72 = tpu.matmul %41, %71, %cst_44 {dimension_numbers = #tpu.dot_dimension_numbers<[1], [0], [0], [1], [0, 0, 1, 1], [], []>} : vector<64x4xbf16>, vector<4x8xbf16>, vector<64x8xf32> -> vector<64x8xf32>
    %73 = arith.addf %69, %72 : vector<64x8xf32>
    %c2_i32 = arith.constant 2 : i32
    %74 = arith.addi %1, %c2_i32 : i32
    %c0_45 = arith.constant 0 : index
    %75 = arith.index_cast %74 : i32 to index
    %c0_46 = arith.constant 0 : index
    %c0_47 = arith.constant 0 : index
    %76 = vector.load %arg2[%c0_45, %75, %c0_46, %c0_47] : memref<1x18x18x4xbf16, #tpu.memory_space<vmem>>, vector<1x4x18x4xbf16>
    %77 = vector.shape_cast %76 : vector<1x4x18x4xbf16> to vector<4x18x4xbf16>
    %78 = vector.extract_strided_slice %77 {offsets = [0, 0, 0], sizes = [4, 16, 4], strides = [1, 1, 1]} : vector<4x18x4xbf16> to vector<4x16x4xbf16>
    %79 = vector.shape_cast %78 : vector<4x16x4xbf16> to vector<64x4xbf16>
    %80 = vector.extract_strided_slice %77 {offsets = [0, 1, 0], sizes = [4, 16, 4], strides = [1, 1, 1]} : vector<4x18x4xbf16> to vector<4x16x4xbf16>
    %81 = vector.shape_cast %80 : vector<4x16x4xbf16> to vector<64x4xbf16>
    %82 = vector.extract_strided_slice %77 {offsets = [0, 2, 0], sizes = [4, 16, 4], strides = [1, 1, 1]} : vector<4x18x4xbf16> to vector<4x16x4xbf16>
    %83 = vector.shape_cast %82 : vector<4x16x4xbf16> to vector<64x4xbf16>
    %c10 = arith.constant 10 : index
    %c0_48 = arith.constant 0 : index
    %c0_49 = arith.constant 0 : index
    %84 = vector.load %arg3[%c10, %c0_48, %c0_49] : memref<16x4x8xbf16, #tpu.memory_space<vmem>>, vector<1x4x8xbf16>
    %85 = vector.shape_cast %84 : vector<1x4x8xbf16> to vector<4x8xbf16>
    %cst_50 = arith.constant dense<0.000000e+00> : vector<64x8xf32>
    %86 = tpu.matmul %79, %85, %cst_50 {dimension_numbers = #tpu.dot_dimension_numbers<[1], [0], [0], [1], [0, 0, 1, 1], [], []>} : vector<64x4xbf16>, vector<4x8xbf16>, vector<64x8xf32> -> vector<64x8xf32>
    %87 = arith.addf %65, %86 : vector<64x8xf32>
    %c11 = arith.constant 11 : index
    %c0_51 = arith.constant 0 : index
    %c0_52 = arith.constant 0 : index
    %88 = vector.load %arg3[%c11, %c0_51, %c0_52] : memref<16x4x8xbf16, #tpu.memory_space<vmem>>, vector<1x4x8xbf16>
    %89 = vector.shape_cast %88 : vector<1x4x8xbf16> to vector<4x8xbf16>
    %cst_53 = arith.constant dense<0.000000e+00> : vector<64x8xf32>
    %90 = tpu.matmul %81, %89, %cst_53 {dimension_numbers = #tpu.dot_dimension_numbers<[1], [0], [0], [1], [0, 0, 1, 1], [], []>} : vector<64x4xbf16>, vector<4x8xbf16>, vector<64x8xf32> -> vector<64x8xf32>
    %91 = arith.addf %87, %90 : vector<64x8xf32>
    %c14 = arith.constant 14 : index
    %c0_54 = arith.constant 0 : index
    %c0_55 = arith.constant 0 : index
    %92 = vector.load %arg3[%c14, %c0_54, %c0_55] : memref<16x4x8xbf16, #tpu.memory_space<vmem>>, vector<1x4x8xbf16>
    %93 = vector.shape_cast %92 : vector<1x4x8xbf16> to vector<4x8xbf16>
    %cst_56 = arith.constant dense<0.000000e+00> : vector<64x8xf32>
    %94 = tpu.matmul %81, %93, %cst_56 {dimension_numbers = #tpu.dot_dimension_numbers<[1], [0], [0], [1], [0, 0, 1, 1], [], []>} : vector<64x4xbf16>, vector<4x8xbf16>, vector<64x8xf32> -> vector<64x8xf32>
    %95 = arith.addf %73, %94 : vector<64x8xf32>
    %c15 = arith.constant 15 : index
    %c0_57 = arith.constant 0 : index
    %c0_58 = arith.constant 0 : index
    %96 = vector.load %arg3[%c15, %c0_57, %c0_58] : memref<16x4x8xbf16, #tpu.memory_space<vmem>>, vector<1x4x8xbf16>
    %97 = vector.shape_cast %96 : vector<1x4x8xbf16> to vector<4x8xbf16>
    %cst_59 = arith.constant dense<0.000000e+00> : vector<64x8xf32>
    %98 = tpu.matmul %83, %97, %cst_59 {dimension_numbers = #tpu.dot_dimension_numbers<[1], [0], [0], [1], [0, 0, 1, 1], [], []>} : vector<64x4xbf16>, vector<4x8xbf16>, vector<64x8xf32> -> vector<64x8xf32>
    %99 = arith.addf %95, %98 : vector<64x8xf32>
    %c0_60 = arith.constant 0 : index
    %c0_61 = arith.constant 0 : index
    %100 = vector.load %arg4[%c0_60, %c0_61] : memref<1x16xf32, #tpu.memory_space<vmem>>, vector<1x16xf32>
    %101 = vector.shape_cast %100 : vector<1x16xf32> to vector<16xf32>
    %102 = tpu.concatenate %49, %57 in 1 : vector<64x8xf32>, vector<64x8xf32> -> vector<64x16xf32>
    %103 = vector.shape_cast %101 : vector<16xf32> to vector<1x16xf32>
    %104 = vector.broadcast %103 : vector<1x16xf32> to vector<64x16xf32>
    %105 = arith.addf %102, %104 : vector<64x16xf32>
    %cst_62 = arith.constant 0.000000e+00 : f32
    %106 = vector.broadcast %cst_62 : f32 to vector<64x16xf32>
    %107 = arith.maximumf %105, %106 : vector<64x16xf32>
    %108 = vector.shape_cast %107 : vector<64x16xf32> to vector<4x16x16xf32>
    %c0_63 = arith.constant 0 : index
    %c0_64 = arith.constant 0 : index
    %c0_65 = arith.constant 0 : index
    %c0_66 = arith.constant 0 : index
    %c0_67 = arith.constant 0 : index
    %109 = vector.load %arg5[%c0_63, %c0_64, %c0_65, %c0_66, %c0_67] : memref<1x4x2x16x16xf32, #tpu.memory_space<vmem>>, vector<1x4x1x16x16xf32>
    %110 = vector.shape_cast %109 : vector<1x4x1x16x16xf32> to vector<4x16x16xf32>
    %111 = vector.shape_cast %108 : vector<4x16x16xf32> to vector<1x4x1x16x16xf32>
    tpu.vector_store %arg5[%c0_63, %c0_64, %c0_65, %c0_66, %c0_67], %111 {strides = array<i32>} : memref<1x4x2x16x16xf32, #tpu.memory_space<vmem>>, vector<1x4x1x16x16xf32>,
    %112 = tpu.concatenate %91, %99 in 1 : vector<64x8xf32>, vector<64x8xf32> -> vector<64x16xf32>
    %113 = vector.shape_cast %101 : vector<16xf32> to vector<1x16xf32>
    %114 = vector.broadcast %113 : vector<1x16xf32> to vector<64x16xf32>
    %115 = arith.addf %112, %114 : vector<64x16xf32>
    %cst_68 = arith.constant 0.000000e+00 : f32
    %116 = vector.broadcast %cst_68 : f32 to vector<64x16xf32>
    %117 = arith.maximumf %115, %116 : vector<64x16xf32>
    %118 = vector.shape_cast %117 : vector<64x16xf32> to vector<4x16x16xf32>
    %c0_69 = arith.constant 0 : index
    %c0_70 = arith.constant 0 : index
    %c1_71 = arith.constant 1 : index
    %c0_72 = arith.constant 0 : index
    %c0_73 = arith.constant 0 : index
    %119 = vector.load %arg5[%c0_69, %c0_70, %c1_71, %c0_72, %c0_73] : memref<1x4x2x16x16xf32, #tpu.memory_space<vmem>>, vector<1x4x1x16x16xf32>
    %120 = vector.shape_cast %119 : vector<1x4x1x16x16xf32> to vector<4x16x16xf32>
    %121 = vector.shape_cast %118 : vector<4x16x16xf32> to vector<1x4x1x16x16xf32>
    tpu.vector_store %arg5[%c0_69, %c0_70, %c1_71, %c0_72, %c0_73], %121 {strides = array<i32>} : memref<1x4x2x16x16xf32, #tpu.memory_space<vmem>>, vector<1x4x1x16x16xf32>,
    return
  }
  func.func @transform_0(%arg0: i32, %arg1: i32) -> (i32, i32, i32, i32) {
    %c0_i32 = arith.constant 0 : i32
    %c0_i32_0 = arith.constant 0 : i32
    %c0_i32_1 = arith.constant 0 : i32
    %c0_i32_2 = arith.constant 0 : i32
    return %arg0, %c0_i32, %c0_i32_0, %c0_i32_1 : i32, i32, i32, i32
  }
  func.func @transform_1(%arg0: i32, %arg1: i32) -> (i32, i32, i32) {
    %c0_i32 = arith.constant 0 : i32
    %c0_i32_0 = arith.constant 0 : i32
    %c0_i32_1 = arith.constant 0 : i32
    %c0_i32_2 = arith.constant 0 : i32
    return %c0_i32, %c0_i32_0, %c0_i32_1 : i32, i32, i32
  }
  func.func @transform_2(%arg0: i32, %arg1: i32) -> (i32, i32) {
    %c0_i32 = arith.constant 0 : i32
    %c0_i32_0 = arith.constant 0 : i32
    %c0_i32_1 = arith.constant 0 : i32
    return %c0_i32, %c0_i32_0 : i32, i32
  }
  func.func @transform_3(%arg0: i32, %arg1: i32) -> (i32, i32, i32, i32, i32) {
    %c0_i32 = arith.constant 0 : i32
    %c0_i32_0 = arith.constant 0 : i32
    %c0_i32_1 = arith.constant 0 : i32
    %c0_i32_2 = arith.constant 0 : i32
    return %arg0, %arg1, %c0_i32, %c0_i32_0, %c0_i32_1 : i32, i32, i32, i32, i32
  }
}

</mosaic_0001>

<bundles_post_ra>
// kernel: tile.9
= control target key start
LH: loop header
LB: loop body
LE: loop exit
PB: predicated region body
PF: predicated region fallthrough
CT: control target
= control target key end

     0   :  { %vm7_vm0 = vcmask 64512   ;;  %vm13_vm1 = vcmask 130112   ;;  %s39_s0 = inlined_call_operand.vmem [shape: f32[2,8], index: 0, kind: input, shape index: {}]   ;;  %s40_s1 = inlined_call_operand.vmem [shape: f32[1,16], index: 1, kind: output, shape index: {}]  }
   0x1   :  { %v4_v0 = vld [vmem:[%s39_s0] sm:$0x3]  ;;  %s22_s0 = smov 8  }
   0x2   :  { %5 = vst [vmem:[#allocation1] sm:$0x3] %v4_v0 }
   0x9   :  { %v10_v1 = vld [vmem:[#allocation1 + $0x1] sm:$0x1]   ;;  %v6_v2 = vld [vmem:[#allocation1] sm:$0x1]  }
   0xa   :  { %11 = vrot.lane.b32.xlu0 %v10_v1, %s22_s0  ;;  %8 = vst.msk [vmem:[#allocation0] sm:$0x1] %vm7_vm0, %v6_v2  }
  0x7c   :  { %v12_v3 = vpop.permute.xlu0 %11  }
  0x7d   :  { %14 = vst.msk [vmem:[#allocation0] sm:$0x1] %vm13_vm1, %v12_v3  }
  0x84   :  { %v17_v4 = vld [vmem:[#allocation0] sm:$0x1] }
  0x85   :  { %20 = vst [vmem:[%s40_s1] sm:$0x1] %v17_v4 }

// kernel: tile.8
= control target key start
LH: loop header
LB: loop body
LE: loop exit
PB: predicated region body
PF: predicated region fallthrough
CT: control target
= control target key end

     0   :  { %s22_s0 = inlined_call_operand.vmem [shape: f32[8], index: 0, kind: input, shape index: {}]   ;;  %s23_s1 = inlined_call_operand.vmem [shape: f32[2,8], index: 1, kind: output, shape index: {}]  }
   0x1   :  { %v4_v0 = vld [vmem:[%s22_s0] ss:$0 sm:$0xff] }
   0x2   :  { %5 = vst [vmem:[%s23_s1] sm:$0x3] %v4_v0 }

// kernel: up_conv_forward.1
= control target key start
LH: loop header
LB: loop body
LE: loop exit
PB: predicated region body
PF: predicated region fallthrough
CT: control target
= control target key end

     0   :  { %s2026_s12 = smov 0   ;;  %s2028_s13 = smov 0   ;;  %s2754_s0 = inlined_call_operand.vmem [shape: bf16[2,18,18,4], index: 0, kind: input, shape index: {}]   ;;  %s2755_s1 = inlined_call_operand.vmem [shape: bf16[16,4,8], index: 1, kind: input, shape index: {}]   ;;  %s2756_s2 = inlined_call_operand.vmem [shape: f32[1,16], index: 2, kind: input, shape index: {}]   ;;  %s2757_s3 = inlined_call_operand.vmem [shape: f32[2,16,2,16,16], index: 3, kind: output, shape index: {}]  }
   0x1   :  { %s2030_s14 = smov 0   ;;  %s2032_s15 = smov 0  }
   0x2   :  { %s2034_s16 = smov 0  }
   0x3 LB: > { %s22_s17 = sadd.s32 1, %s1995_s14  ;;  %s25_s18 = sadd.s32 1, %s1999_s15  ;;  %s2003_s16 = sphi %s2034_s16, %s13_s16   ;;  %s1999_s15 = sphi %s2032_s15, %s2765_s15   ;;  %s1995_s14 = sphi %s2030_s14, %s2764_s14   ;;  %s1991_s13 = sphi %s2028_s13, %s2763_s13   ;;  %s1987_s12 = sphi %s2026_s12, %s2762_s12  }
   0x4   : > { %p23_p0 = scmp.ge.s32.totalorder %s22_s17, 4  ;;  %p1723_p1 = scmp.ge.s32.totalorder %s2003_s16, 1 }
   0x5   : > { %p151_p2 = scmp.lt.s32.totalorder %s2003_s16, 9 }
   0x6   : > { %s2767_s17 = smov (%p23_p0, %s22_s17), 0  ;;  %s2769_s18 = smov (!%p23_p0, %s25_s18), %s1999_s15 }
   0x7   : > { %p152_p3 = pnand %p1723_p1, %p151_p2  ;;  %p27_p4 = scmp.ge.s32.totalorder %s2769_s18, 2 }
   0x8   : > { %p180_p5 = scmp.lt.s32.totalorder (!%p152_p3), %s1991_s13, 1  ;;  %s1909_s25 = smul.u32 (!%p152_p3), 48, %s1987_s12 }
   0x9   : > { %s2771_s18 = smov (%p27_p4, %s2769_s18), 0  ;;  %155 = sbr.rel (%p152_p3) target bundleno = 538 (0x21a), region = 32 }
   0xa   : > { %s2005_s7 = smov (!%p152_p3), 8  }
   0xe   : > { %vm383_vm0 = vcmask 1041408   ;;  %v1762_v0 = vld [vmem:[%s2755_s1 + $0xa] sm:$0x3]  ;;  %v1761_v2 = vld [vmem:[%s2755_s1 + $0x8] sm:$0x3]  ;;  %s2773_s13 = smov (!%p180_p5, %s1991_s13), 1 }
   0xf   : > { %v501_v1 = vsel %vm383_vm0, %v1762_v0, 0  ;;  %v533_v3 = vsel %vm383_vm0, %v1761_v2, 0  ;;  %v1815_v4 = vld [vmem:[%s2755_s1 + $0xc] sm:$0x3]  ;;  %v1820_v6 = vld [vmem:[%s2755_s1 + $0xe] sm:$0x3] }
  0x10   : > { %510 = vmatpush.bf16.msra.mxu2 %v501_v1  ;;  %542 = vmatpush.bf16.msra.mxu3 %v533_v3  ;;  %v851_v5 = vsel %vm383_vm0, %v1815_v4, 0  ;;  %s1922_s28 = smul.u32 216, %s2773_s13  ;;  %vm324_vm1 = vcmask 1042432   ;;  %vm325_vm2 = vcmask 1046532   ;;  %v917_v7 = vsel %vm383_vm0, %v1820_v6, 0  ;;  %s1727_s20 = sshll.u32 %s2773_s13, 6 }
  0x11   : > { %vm2083_vm3 = vmor %vm324_vm1, %vm325_vm2  ;;  %vm213_vm4 = vsmask.f32 3328  ;;  %vm214_vm5 = vsmask.f32 7440  ;;  %vm370_vm6 = vcmask 31744   ;;  %vm1517_vm8 = vcmask 64512  }
  0x12   : > { %s184_s4 = scalar_lea.vmem %s2754_s0, %s1922_s28  ;;  %vm2099_vm7 = vmor %vm213_vm4, %vm214_vm5  ;;  %vm1545_vm9 = vcmask 130048  }
  0x13   : > { %s2081_s5 = scalar_lea.vmem %s184_s4, %s1909_s25 }
  0x14   : > { %860 = vmatpush.bf16.msrb.mxu2 %v851_v5  ;;  %926 = vmatpush.bf16.msrb.mxu3 %v917_v7  ;;  %v201_v9 = vld [vmem:[%s2081_s5] sm:$0xf]  ;;  %v202_v10 = vld [vmem:[%s2081_s5 + $0x4] sm:$0xf]  ;;  %v203_v11 = vld [vmem:[%s2081_s5 + $0x8] sm:$0x1] }
  0x15   : > { %v1732_v12 = vrot.slane %v201_v9, 9  ;;  %v329_v13 = vrot.slane %v202_v10, 5  ;;  %v332_v14 = vrot.slane %v203_v11, 5  ;;  %v217_v15 = vshrl.u32 %v201_v9, 16  ;;  %v204_v23 = vld [vmem:[%s2081_s5 + $0xc] sm:$0xf] }
  0x16   : > { %v220_v16 = vshll.u32 %v201_v9, 16  ;;  %v226_v17 = vshll.u32 %v202_v10, 16  ;;  %v230_v18 = vshrl.u32 %v202_v10, 16  ;;  %v236_v19 = vshll.u32 %v203_v11, 16  ;;  %v205_v28 = vld [vmem:[%s2081_s5 + $0x10] sm:$0xf] }
  0x17   : > { %v330_v20 = vsel %vm2083_vm3, %v1732_v12, %v329_v13  ;;  %v331_v21 = vrot.slane %v329_v13, 4  ;;  %v219_v22 = vrot.slane %v217_v15, 4  ;;  %v206_v34 = vld [vmem:[%s2081_s5 + $0x14] sm:$0x1]  ;;  %v241_v35 = vshrl.u32 %v204_v23, 16 }
  0x18   : > { %v476_v24 = vunpack.c.l.b16 %v330_v20  ;;  %v222_v25 = vrot.slane %v220_v16, 5  ;;  %v228_v26 = vrot.slane %v226_v17, 5  ;;  %v232_v27 = vrot.slane %v230_v18, 4  ;;  %v207_v0 = vld [vmem:[%s2081_s5 + $0x18] sm:$0xf] }
  0x19   : > { %v333_v29 = vsel %vm2083_vm3, %v331_v21, %v332_v14  ;;  %v238_v30 = vrot.slane %v236_v19, 5  ;;  %v336_v37 = vrot.slane %v205_v28, 5  ;;  %v244_v38 = vshll.u32 %v204_v23, 16  ;;  %v208_v1 = vld [vmem:[%s2081_s5 + $0x1c] sm:$0xf] }
  0x1a   : > { %v477_v31 = vunpack.c.l.b16 %v333_v29  ;;  %v223_v32 = vor.u32 %v222_v25, %v219_v22  ;;  %v233_v33 = vor.u32 %v232_v27, %v228_v26  ;;  %v250_v39 = vshll.u32 %v205_v28, 16  ;;  %v209_v14 = vld [vmem:[%s2081_s5 + $0x20] sm:$0x1]  ;;  %v1736_v22 = vld [vmem:[%s2755_s1 + $0x2] sm:$0x3] }
  0x1b   : > { %v1733_v43 = vrot.slane %v204_v23, 9  ;;  %v339_v44 = vrot.slane %v206_v34, 5  ;;  %v243_v45 = vrot.slane %v241_v35, 4  ;;  %v246_v46 = vrot.slane %v244_v38, 5  ;;  %v355_v23 = vld [vmem:[%s2755_s1] sm:$0x3] }
  0x1c   : > { %v484_v40 = vpack.c.b16 %v477_v31, %v476_v24  ;;  %v224_v41 = vrot.slane %v223_v32, 4  ;;  %v234_v42 = vrot.slane %v233_v33, 4  ;;  %v252_v49 = vrot.slane %v250_v39, 5  ;;  %v1910_v33 = vld [vmem:[%s2081_s5] sm:$0xff]  ;;  %v211_v39 = vld [vmem:[%s2081_s5 + $0x28] sm:$0xf] }
  0x1d   : > { %v254_v50 = vshrl.u32 %v205_v28, 16  ;;  %v338_v53 = vrot.slane %v336_v37, 4  ;;  %v247_v54 = vor.u32 %v246_v46, %v243_v45  ;;  %v260_v56 = vshll.u32 %v206_v34, 16  ;;  %v210_v38 = vld [vmem:[%s2081_s5 + $0x24] sm:$0xf] }
  0x1e   : > { %1763 = vmatmul.msk.bf16.vlgmr.msra.gmra.mxu2 %vm370_vm6, %v484_v40  ;;  %v229_v47 = vsel %vm2099_vm7, %v224_v41, %v228_v26  ;;  %v239_v48 = vsel %vm2099_vm7, %v234_v42, %v238_v30  ;;  %v337_v59 = vsel %vm2083_vm3, %v1733_v43, %v336_v37  ;;  %v265_v5 = vshrl.u32 %v207_v0, 16 }
  0x1f   : > { %v358_v51 = vunpack.c.l.b16 %v229_v47  ;;  %v359_v52 = vunpack.c.l.b16 %v239_v48  ;;  %v256_v55 = vrot.slane %v254_v50, 4  ;;  %v340_v60 = vsel %vm2083_vm3, %v338_v53, %v339_v44  ;;  %v212_v50 = vld [vmem:[%s2081_s5 + $0x2c] sm:$0x1] }
  0x20   : > { %v248_v61 = vrot.slane %v247_v54, 4  ;;  %v262_v63 = vrot.slane %v260_v56, 5  ;;  %v478_v2 = vunpack.c.l.b16 %v337_v59  ;;  %v479_v3 = vunpack.c.l.b16 %v340_v60  ;;  %v1836_v60 = vld [vmem:[%s2755_s1 + $0x1a] sm:$0x3] }
  0x21   : > { %v366_v57 = vpack.c.b16 %v359_v52, %v358_v51  ;;  %v257_v58 = vor.u32 %v256_v55, %v252_v49  ;;  %v268_v7 = vshll.u32 %v207_v0, 16  ;;  %v274_v9 = vshll.u32 %v208_v1, 16 }
  0x22   : > { %v253_v4 = vsel %vm2099_vm7, %v248_v61, %v252_v49  ;;  %v278_v10 = vshrl.u32 %v208_v1, 16  ;;  %v485_v11 = vpack.c.b16 %v479_v3, %v478_v2  ;;  %v343_v15 = vrot.slane %v208_v1, 5 }
  0x23   : > { %1767 = vmatmul.msk.bf16.vlgmr.msra.gmra.mxu3 %vm370_vm6, %v366_v57  ;;  %v258_v62 = vrot.slane %v257_v58, 4  ;;  %v360_v12 = vunpack.c.l.b16 %v253_v4  ;;  %v267_v16 = vrot.slane %v265_v5, 4  ;;  %v270_v17 = vrot.slane %v268_v7, 5 }
  0x24   : > { %v276_v18 = vrot.slane %v274_v9, 5  ;;  %v280_v19 = vrot.slane %v278_v10, 4  ;;  %v1734_v20 = vrot.slane %v207_v0, 9  ;;  %v346_v21 = vrot.slane %v209_v14, 5 }
  0x25   : > { %v263_v6 = vsel %vm2099_vm7, %v258_v62, %v262_v63  ;;  %v345_v25 = vrot.slane %v343_v15, 4  ;;  %v385_v26 = vsel %vm383_vm0, %v1736_v22, 0  ;;  %v441_v27 = vsel %vm383_vm0, %v355_v23, 0  ;;  %v2149_v62 = vld [vmem:[%s2081_s5 + $0xc] sm:$0xf] }
  0x26   : > { %v361_v13 = vunpack.c.l.b16 %v263_v6  ;;  %v271_v28 = vor.u32 %v270_v17, %v267_v16  ;;  %v281_v29 = vor.u32 %v280_v19, %v276_v18  ;;  %v284_v30 = vshll.u32 %v209_v14, 16  ;;  %394 = vmatpush.bf16.msra.mxu0 %v385_v26  ;;  %450 = vmatpush.bf16.msra.mxu1 %v441_v27  ;;  %v1774_v63 = vld [vmem:[%s2081_s5 + $0x10] sm:$0xf]  ;;  %v1775_v23 = vld [vmem:[%s2081_s5 + $0x14] sm:$0x1] }
  0x27   : > { %v344_v31 = vsel %vm2083_vm3, %v1734_v20, %v343_v15  ;;  %v347_v32 = vsel %vm2083_vm3, %v345_v25, %v346_v21  ;;  %v289_v42 = vshrl.u32 %v210_v38, 16  ;;  %v292_v43 = vshll.u32 %v210_v38, 16 }
  0x28   : > { %v367_v24 = vpack.c.b16 %v361_v13, %v360_v12  ;;  %v272_v34 = vrot.slane %v271_v28, 4  ;;  %v282_v35 = vrot.slane %v281_v29, 4  ;;  %v286_v37 = vrot.slane %v284_v30, 5  ;;  %v1911_v12 = vld [vmem:[%s2081_s5 + $0xc] sm:$0xff] }
  0x29   : > { %1737 = vmatmul.msk.bf16.vlgmr.msra.gmra.mxu0 %vm370_vm6, %v366_v57  ;;  %1757 = vmatmul.msk.bf16.vlgmr.msra.gmra.mxu1 %vm370_vm6, %v1910_v33  ;;  %v480_v40 = vunpack.c.l.b16 %v344_v31  ;;  %v481_v41 = vunpack.c.l.b16 %v347_v32  ;;  %v298_v46 = vshll.u32 %v211_v39, 16  ;;  %v302_v47 = vshrl.u32 %v211_v39, 16 }
  0x2a   : > { %v277_v44 = vsel %vm2099_vm7, %v272_v34, %v276_v18  ;;  %v287_v45 = vsel %vm2099_vm7, %v282_v35, %v286_v37  ;;  %v350_v48 = vrot.slane %v211_v39, 5  ;;  %v291_v53 = vrot.slane %v289_v42, 4  ;;  %v1777_v39 = vld [vmem:[%s2081_s5 + $0x1c] sm:$0xf] }
  0x2b   : > { %v486_v49 = vpack.c.b16 %v481_v41, %v480_v40  ;;  %v362_v51 = vunpack.c.l.b16 %v277_v44  ;;  %v363_v52 = vunpack.c.l.b16 %v287_v45  ;;  %v294_v54 = vrot.slane %v292_v43, 5 }
  0x2c   : > { %v300_v55 = vrot.slane %v298_v46, 5  ;;  %v304_v56 = vrot.slane %v302_v47, 4  ;;  %v1735_v57 = vrot.slane %v210_v38, 9  ;;  %v352_v58 = vrot.slane %v350_v48, 4  ;;  %v1776_v38 = vld [vmem:[%s2081_s5 + $0x18] sm:$0xf] }
  0x2d   : > { %v353_v59 = vrot.slane %v212_v50, 5  ;;  %v368_v61 = vpack.c.b16 %v363_v52, %v362_v51  ;;  %v1029_v0 = vsel %vm383_vm0, %v1836_v60, 0  ;;  %v295_v1 = vor.u32 %v294_v54, %v291_v53  ;;  %v1912_v47 = vld [vmem:[%s2081_s5 + $0x18] sm:$0xff] }
  0x2e   : > { %1764 = vmatmul.msk.bf16.gmra.mxu2 %vm370_vm6, %v485_v11  ;;  %v305_v2 = vor.u32 %v304_v56, %v300_v55  ;;  %v308_v3 = vshll.u32 %v212_v50, 16  ;;  %v351_v4 = vsel %vm2083_vm3, %v1735_v57, %v350_v48  ;;  %v581_v6 = vshrl.u32 %v2149_v62, 16  ;;  %v1835_v11 = vld [vmem:[%s2755_s1 + $0x18] sm:$0x3] }
  0x2f   : > { %1038 = vmatpush.bf16.msra.mxu2 %v1029_v0  ;;  %v354_v5 = vsel %vm2083_vm3, %v352_v58, %v353_v59  ;;  %v584_v7 = vshll.u32 %v2149_v62, 16  ;;  %v590_v9 = vshll.u32 %v1774_v63, 16  ;;  %v594_v10 = vshrl.u32 %v1774_v63, 16  ;;  %v1778_v58 = vld [vmem:[%s2081_s5 + $0x20] sm:$0x1] }
  0x30   : > { %v296_v13 = vrot.slane %v295_v1, 4  ;;  %v306_v14 = vrot.slane %v305_v2, 4  ;;  %v310_v15 = vrot.slane %v308_v3, 5  ;;  %v1061_v16 = vsel %vm383_vm0, %v1835_v11, 0  ;;  %v2194_v1 = vld [vmem:[%s2081_s5 + $0x24] sm:$0xf] }
  0x31   : > { %v482_v17 = vunpack.c.l.b16 %v351_v4  ;;  %v483_v18 = vunpack.c.l.b16 %v354_v5  ;;  %1070 = vmatpush.bf16.msra.mxu3 %v1061_v16  ;;  %v583_v19 = vrot.slane %v581_v6, 4  ;;  %v586_v20 = vrot.slane %v584_v7, 5  ;;  %v1780_v6 = vld [vmem:[%s2081_s5 + $0x28] sm:$0xf] }
  0x32   : > { %v592_v21 = vrot.slane %v590_v9, 5  ;;  %v596_v22 = vrot.slane %v594_v10, 4  ;;  %v311_v25 = vsel %vm2099_vm7, %v306_v14, %v310_v15  ;;  %v600_v29 = vshll.u32 %v1775_v23, 16  ;;  %v1913_v15 = vld [vmem:[%s2081_s5 + $0x24] sm:$0xff] }
  0x33   : > { %1768 = vmatmul.msk.bf16.gmra.mxu3 %vm370_vm6, %v367_v24  ;;  %v487_v26 = vpack.c.b16 %v483_v18, %v482_v17  ;;  %v587_v27 = vor.u32 %v586_v20, %v583_v19  ;;  %v365_v31 = vunpack.c.l.b16 %v311_v25  ;;  %v690_v37 = vrot.slane %v1774_v63, 5 }
  0x34   : > { %v597_v28 = vor.u32 %v596_v22, %v592_v21  ;;  %v602_v34 = vrot.slane %v600_v29, 5  ;;  %v1785_v42 = vrot.slane %v2149_v62, 9  ;;  %v605_v43 = vshrl.u32 %v1776_v38, 16 }
  0x35   : > { %v588_v32 = vrot.slane %v587_v27, 4  ;;  %v608_v44 = vshll.u32 %v1776_v38, 16  ;;  %v614_v45 = vshll.u32 %v1777_v39, 16  ;;  %v618_v46 = vshrl.u32 %v1777_v39, 16 }
  0x36   : > { %v598_v33 = vrot.slane %v597_v28, 4  ;;  %v692_v48 = vrot.slane %v690_v37, 4  ;;  %v691_v52 = vsel %vm2083_vm3, %v1785_v42, %v690_v37  ;;  %v607_v53 = vrot.slane %v605_v43, 4 }
  0x37   : > { %v593_v40 = vsel %vm2099_vm7, %v588_v32, %v592_v21  ;;  %v610_v54 = vrot.slane %v608_v44, 5  ;;  %v620_v56 = vrot.slane %v618_v46, 4  ;;  %v892_v60 = vunpack.c.l.b16 %v691_v52  ;;  %v1782_v44 = vld [vmem:[%s2081_s5 + $0x30] sm:$0xf] }
  0x38   : > { %v603_v41 = vsel %vm2099_vm7, %v598_v33, %v602_v34  ;;  %v784_v50 = vunpack.c.l.b16 %v593_v40  ;;  %v624_v0 = vshll.u32 %v1778_v58, 16  ;;  %v697_v7 = vrot.slane %v1777_v39, 5  ;;  %v1789_v39 = vld [vmem:[%s2755_s1 + $0x4] sm:$0x3]  ;;  %v1810_v40 = vld [vmem:[%s2755_s1 + $0x6] sm:$0x3] }
  0x39   : > { %1738 = vmatmul.msk.bf16.gmra.mxu0 %vm370_vm6, %v367_v24  ;;  %1758 = vmatmul.msk.bf16.gmra.mxu1 %vm370_vm6, %v1911_v12  ;;  %v301_v24 = vsel %vm2099_vm7, %v296_v13, %v300_v55  ;;  %v785_v51 = vunpack.c.l.b16 %v603_v41  ;;  %v616_v55 = vrot.slane %v614_v45, 5  ;;  %v611_v62 = vor.u32 %v610_v54, %v607_v53  ;;  %v1783_v45 = vld [vmem:[%s2081_s5 + $0x34] sm:$0xf] }
  0x3a   : > { %v364_v30 = vunpack.c.l.b16 %v301_v24  ;;  %v626_v5 = vrot.slane %v624_v0, 5  ;;  %v629_v9 = vshrl.u32 %v2194_v1, 16  ;;  %v632_v10 = vshll.u32 %v2194_v1, 16 }
  0x3b   : > { %v2189_v59 = vpack.c.b16 %v785_v51, %v784_v50  ;;  %v621_v63 = vor.u32 %v620_v56, %v616_v55  ;;  %v612_v3 = vrot.slane %v611_v62, 4  ;;  %v638_v11 = vshll.u32 %v1780_v6, 16  ;;  %v2237_v51 = vld [vmem:[%s2081_s5 + $0xc] sm:$0xff] }
  0x3c   : > { %v369_v35 = vpack.c.b16 %v365_v31, %v364_v30  ;;  %v642_v12 = vshrl.u32 %v1780_v6, 16  ;;  %v1786_v16 = vrot.slane %v1776_v38, 9  ;;  %v699_v17 = vrot.slane %v697_v7, 4 }
  0x3d   : > { %v622_v4 = vrot.slane %v621_v63, 4  ;;  %v617_v13 = vsel %vm2099_vm7, %v612_v3, %v616_v55  ;;  %v700_v18 = vrot.slane %v1778_v58, 5  ;;  %v631_v19 = vrot.slane %v629_v9, 4 }
  0x3e   : > { %1765 = vmatmul.msk.bf16.gmra.mxu2 %vm370_vm6, %v486_v49  ;;  %v693_v49 = vrot.slane %v1775_v23, 5  ;;  %v634_v20 = vrot.slane %v632_v10, 5  ;;  %v786_v21 = vunpack.c.l.b16 %v617_v13  ;;  %v1781_v23 = vld [vmem:[%s2081_s5 + $0x2c] sm:$0x1]  ;;  %v640_v24 = vrot.slane %v638_v11, 5 }
  0x3f   : > { %v627_v14 = vsel %vm2099_vm7, %v622_v4, %v626_v5  ;;  %v644_v25 = vrot.slane %v642_v12, 4  ;;  %v701_v27 = vsel %vm2083_vm3, %v699_v17, %v700_v18  ;;  %v648_v29 = vshll.u32 %v1781_v23, 16  ;;  %v1889_v11 = vld [vmem:[%s2755_s1 + $0x1c] sm:$0x3] }
  0x40   : > { %v694_v57 = vsel %vm2083_vm3, %v692_v48, %v693_v49  ;;  %v787_v22 = vunpack.c.l.b16 %v627_v14  ;;  %v635_v28 = vor.u32 %v634_v20, %v631_v19  ;;  %v895_v33 = vunpack.c.l.b16 %v701_v27  ;;  %v2259_v17 = vld [vmem:[%s2081_s5 + $0x18] sm:$0xff] }
  0x41   : > { %v645_v31 = vor.u32 %v644_v25, %v640_v24  ;;  %v704_v38 = vrot.slane %v1780_v6, 5  ;;  %v743_v42 = vsel %vm383_vm0, %v1789_v39, 0  ;;  %v809_v43 = vsel %vm383_vm0, %v1810_v40, 0  ;;  %v1894_v20 = vld [vmem:[%s2755_s1 + $0x1e] sm:$0x3] }
  0x42   : > { %v2215_v30 = vpack.c.b16 %v787_v22, %v786_v21  ;;  %v636_v34 = vrot.slane %v635_v28, 4  ;;  %752 = vmatpush.bf16.msrb.mxu0 %v743_v42  ;;  %818 = vmatpush.bf16.msrb.mxu1 %v809_v43  ;;  %v1787_v48 = vrot.slane %v2194_v1, 9  ;;  %v707_v50 = vrot.slane %v1781_v23, 5  ;;  %v1784_v1 = vld [vmem:[%s2081_s5 + $0x38] sm:$0x1] }
  0x43   : > { %1769 = vmatmul.msk.bf16.gmra.mxu3 %vm370_vm6, %v368_v61  ;;  %v646_v37 = vrot.slane %v645_v31, 4  ;;  %v706_v49 = vrot.slane %v704_v38, 4  ;;  %v653_v52 = vshrl.u32 %v1782_v44, 16  ;;  %v656_v53 = vshll.u32 %v1782_v44, 16 }
  0x44   : > { %v641_v46 = vsel %vm2099_vm7, %v636_v34, %v640_v24  ;;  %v662_v54 = vshll.u32 %v1783_v45, 16  ;;  %v666_v55 = vshrl.u32 %v1783_v45, 16  ;;  %v705_v58 = vsel %vm2083_vm3, %v1787_v48, %v704_v38  ;;  %v2285_v34 = vld [vmem:[%s2081_s5 + $0x24] sm:$0xff] }
  0x45   : > { %v788_v56 = vunpack.c.l.b16 %v641_v46  ;;  %v658_v62 = vrot.slane %v656_v53, 5  ;;  %v896_v4 = vunpack.c.l.b16 %v705_v58  ;;  %v672_v9 = vshll.u32 %v1784_v1, 16 }
  0x46   : > { %v664_v63 = vrot.slane %v662_v54, 5  ;;  %v668_v0 = vrot.slane %v666_v55, 4  ;;  %v1788_v21 = vrot.slane %v1782_v44, 9  ;;  %v714_v23 = vrot.slane %v1784_v1, 5  ;;  %v1847_v55 = vld [vmem:[%s2081_s5 + $0x18] sm:$0xf] }
  0x47   : > { %v674_v14 = vrot.slane %v672_v9, 5  ;;  %v1445_v24 = vsel %vm383_vm0, %v1894_v20, 0  ;;  %v1109_v58 = vshrl.u32 %v1847_v55, 16  ;;  %v2365_v20 = vld [vmem:[%s2081_s5 + $0x24] sm:$0xf] }
  0x49   : > { %1739 = vmatmul.msk.bf16.gmra.mxu0 %vm370_vm6, %v368_v61  ;;  %1759 = vmatmul.msk.bf16.gmra.mxu1 %vm370_vm6, %v1912_v47  ;;  %v893_v61 = vunpack.c.l.b16 %v694_v57 }
  0x4b   : > { %v2196_v2 = vpack.c.b16 %v893_v61, %v892_v60  ;;  %v708_v60 = vsel %vm2083_vm3, %v706_v49, %v707_v50  ;;  %v655_v61 = vrot.slane %v653_v52, 4 }
  0x4c   : > { %v897_v5 = vunpack.c.l.b16 %v708_v60  ;;  %v1112_v60 = vshll.u32 %v1847_v55, 16 }
  0x4d   : > { %v659_v6 = vor.u32 %v658_v62, %v655_v61 }
  0x4e   : > { %1766 = vmatmul.msk.bf16.gmra.mxu2 %vm370_vm6, %v487_v26  ;;  %v698_v26 = vsel %vm2083_vm3, %v1786_v16, %v697_v7  ;;  %v669_v7 = vor.u32 %v668_v0, %v664_v63  ;;  %v902_v10 = vpack.c.b16 %v897_v5, %v896_v4  ;;  %v711_v16 = vrot.slane %v1783_v45, 5  ;;  %v1825_v45 = vld [vmem:[%s2755_s1 + $0x10] sm:$0x3] }
  0x4f   : > { %v894_v32 = vunpack.c.l.b16 %v698_v26  ;;  %v660_v12 = vrot.slane %v659_v6, 4  ;;  %v1111_v0 = vrot.slane %v1109_v58, 4  ;;  %v1114_v1 = vrot.slane %v1112_v60, 5  ;;  %v1852_v58 = vld [vmem:[%s2081_s5 + $0x2c] sm:$0x1] }
  0x50   : > { %v670_v13 = vrot.slane %v669_v7, 4  ;;  %v713_v22 = vrot.slane %v711_v16, 4  ;;  %v712_v27 = vsel %vm2083_vm3, %v1788_v21, %v711_v16  ;;  %v1849_v7 = vld [vmem:[%s2081_s5 + $0x20] sm:$0x1] }
  0x51   : > { %v2225_v41 = vpack.c.b16 %v895_v33, %v894_v32  ;;  %v665_v18 = vsel %vm2099_vm7, %v660_v12, %v664_v63  ;;  %v898_v31 = vunpack.c.l.b16 %v712_v27  ;;  %v1128_v12 = vshll.u32 %v1849_v7, 16 }
  0x52   : > { %v675_v19 = vsel %vm2099_vm7, %v670_v13, %v674_v14  ;;  %v790_v25 = vunpack.c.l.b16 %v665_v18  ;;  %v715_v28 = vsel %vm2083_vm3, %v713_v22, %v714_v23  ;;  %v1136_v27 = vshll.u32 %v2365_v20, 16 }
  0x53   : > { %1770 = vmatmul.msk.bf16.gmra.mxu3 %vm370_vm6, %v369_v35  ;;  %v791_v26 = vunpack.c.l.b16 %v675_v19  ;;  %v899_v32 = vunpack.c.l.b16 %v715_v28  ;;  %v1130_v18 = vrot.slane %v1128_v12, 5 }
  0x55   : > { %v2282_v33 = vpack.c.b16 %v899_v32, %v898_v31 }
  0x59   : > { %1740 = vmatmul.msk.bf16.gmra.mxu0 %vm370_vm6, %v369_v35  ;;  %1760 = vmatmul.msk.bf16.gmra.mxu1 %vm370_vm6, %v1913_v15  ;;  %v650_v35 = vrot.slane %v648_v29, 5  ;;  %v1379_v15 = vsel %vm383_vm0, %v1889_v11, 0  ;;  %v2278_v29 = vpack.c.b16 %v791_v26, %v790_v25  ;;  %v1133_v26 = vshrl.u32 %v2365_v20, 16 }
  0x5b   : > { %v651_v47 = vsel %vm2099_vm7, %v646_v37, %v650_v35  ;;  %v2298_v37 = vld [vmem:[%s2081_s5 + $0x30] sm:$0xff] }
  0x5c   : > { %v789_v57 = vunpack.c.l.b16 %v651_v47  ;;  %v993_v47 = vsel %vm383_vm0, %v1825_v45, 0 }
  0x5d   : > { %1002 = vmatpush.bf16.msra.mxu1 %v993_v47 }
  0x5e   : > { %1816 = vmatmul.msk.bf16.vlgmr.msrb.gmra.mxu2 %vm370_vm6, %v2189_v59  ;;  %v2250_v3 = vpack.c.b16 %v789_v57, %v788_v56  ;;  %v1848_v56 = vld [vmem:[%s2081_s5 + $0x1c] sm:$0xf] }
  0x5f   : > { %1388 = vmatpush.bf16.msrb.mxu2 %v1379_v15  ;;  %v1118_v61 = vshll.u32 %v1848_v56, 16  ;;  %v1218_v21 = vrot.slane %v1848_v56, 5 }
  0x61   : > { %v1120_v4 = vrot.slane %v1118_v61, 5 }
  0x63   : > { %1821 = vmatmul.msk.bf16.vlgmr.msrb.gmra.mxu3 %vm370_vm6, %v2196_v2 }
  0x64   : > { %1454 = vmatpush.bf16.msrb.mxu3 %v1445_v24 }
  0x69   : > { %1806 = vmatmul.msk.bf16.vlgmr.msrb.gmra.mxu0 %vm370_vm6, %v2237_v51  ;;  %1811 = vmatmul.msk.bf16.vlgmr.msrb.gmra.mxu1 %vm370_vm6, %v2189_v59 }
  0x6e   : > { %1817 = vmatmul.msk.bf16.gmra.mxu2 %vm370_vm6, %v2215_v30 }
  0x73   : > { %1822 = vmatmul.msk.bf16.gmra.mxu3 %vm370_vm6, %v2225_v41 }
  0x79   : > { %1807 = vmatmul.msk.bf16.gmra.mxu0 %vm370_vm6, %v2259_v17  ;;  %1812 = vmatmul.msk.bf16.gmra.mxu1 %vm370_vm6, %v2215_v30 }
  0x7e   : > { %1818 = vmatmul.msk.bf16.gmra.mxu2 %vm370_vm6, %v2250_v3 }
  0x83   : > { %1823 = vmatmul.msk.bf16.gmra.mxu3 %vm370_vm6, %v902_v10 }
  0x89   : > { %1808 = vmatmul.msk.bf16.gmra.mxu0 %vm370_vm6, %v2285_v34  ;;  %1813 = vmatmul.msk.bf16.gmra.mxu1 %vm370_vm6, %v2250_v3 }
  0x8e   : > { %1819 = vmatmul.msk.bf16.gmra.mxu2 %vm370_vm6, %v2278_v29 }
  0x93   : > { %1824 = vmatmul.msk.bf16.gmra.mxu3 %vm370_vm6, %v2282_v33 }
  0x99   : > { %1809 = vmatmul.msk.bf16.gmra.mxu0 %vm370_vm6, %v2298_v37  ;;  %1814 = vmatmul.msk.bf16.gmra.mxu1 %vm370_vm6, %v2278_v29 }
  0x9e   : > { %1837 = vmatmul.msk.bf16.vlgmr.msra.gmra.mxu2 %vm370_vm6, %v2196_v2  ;;  %v1826_v2 = vld [vmem:[%s2755_s1 + $0x12] sm:$0x3] }
  0x9f   : > { %v961_v43 = vsel %vm383_vm0, %v1826_v2, 0  ;;  %v1859_v2 = vrot.slane %v1847_v55, 9 }
  0xa0   : > { %970 = vmatpush.bf16.msra.mxu0 %v961_v43  ;;  %v1221_v43 = vrot.slane %v1849_v7, 5 }
  0xa1   : > { %v2295_v35 = vpop.f32.mrf.mxu2  ;;  %v1219_v55 = vsel %vm2083_vm3, %v1859_v2, %v1218_v21 }
  0xa3   : > { %1841 = vmatmul.msk.bf16.vlgmr.msra.gmra.mxu3 %vm370_vm6, %v2189_v59 }
  0xa6   : > { %v2306_v38 = vpop.f32.mrf.mxu3  ;;  %v396_v42 = vpop.f32.mrf.mxu0 }
  0xa7   : > { %v452_v46 = vpop.f32.mrf.mxu1 }
  0xa9   : > { %v2308_v39 = vpop.f32.mrf.mxu2  ;;  %1827 = vmatmul.msk.bf16.vlgmr.msra.gmra.mxu0 %vm370_vm6, %v2189_v59  ;;  %1831 = vmatmul.msk.bf16.vlgmr.msra.gmra.mxu1 %vm370_vm6, %v2237_v51  ;;  %v1122_v51 = vshrl.u32 %v1848_v56, 16 }
  0xab   : > { %v1124_v5 = vrot.slane %v1122_v51, 4 }
  0xad   : > { %v1125_v11 = vor.u32 %v1124_v5, %v1120_v4  ;;  %v1420_v5 = vunpack.c.l.b16 %v1219_v55 }
  0xae   : > { %v2310_v40 = vpop.f32.mrf.mxu3  ;;  %1838 = vmatmul.msk.bf16.gmra.mxu2 %vm370_vm6, %v2225_v41  ;;  %v2326_v41 = vadd.f32 %v452_v46, %v396_v42  ;;  %v398_v49 = vpop.f32.mrf.mxu0  ;;  %v1220_v42 = vrot.slane %v1218_v21, 4 }
  0xaf   : > { %v454_v52 = vpop.f32.mrf.mxu1  ;;  %v1126_v16 = vrot.slane %v1125_v11, 4 }
  0xb0   : > { %v2336_v53 = vadd.f32 %v454_v52, %v398_v49  ;;  %v1135_v49 = vrot.slane %v1133_v26, 4  ;;  %v1138_v52 = vrot.slane %v1136_v27, 5  ;;  %v1222_v60 = vsel %vm2083_vm3, %v1220_v42, %v1221_v43 }
  0xb1   : > { %v2318_v44 = vpop.f32.mrf.mxu2  ;;  %v1131_v24 = vsel %vm2099_vm7, %v1126_v16, %v1130_v18  ;;  %v2410_v18 = vld [vmem:[%s2081_s5 + $0x34] sm:$0xf]  ;;  %v545_v26 = vadd.f32 %v2306_v38, %v2295_v35  ;;  %v1228_v35 = vrot.slane %v1852_v58, 5 }
  0xb2   : > { %v1313_v46 = vunpack.c.l.b16 %v1131_v24  ;;  %v1170_v2 = vshrl.u32 %v2410_v18, 16 }
  0xb3   : > { %1842 = vmatmul.msk.bf16.gmra.mxu3 %vm370_vm6, %v2215_v30 }
  0xb6   : > { %v2330_v48 = vpop.f32.mrf.mxu3  ;;  %v401_v57 = vpop.f32.mrf.mxu0 }
  0xb7   : > { %v457_v62 = vpop.f32.mrf.mxu1 }
  0xb8   : > { %v2347_v63 = vadd.f32 %v457_v62, %v401_v57  ;;  %v1139_v62 = vor.u32 %v1138_v52, %v1135_v49 }
  0xb9   : > { %v2334_v50 = vpop.f32.mrf.mxu2  ;;  %1828 = vmatmul.msk.bf16.gmra.mxu0 %vm370_vm6, %v2215_v30  ;;  %1832 = vmatmul.msk.bf16.gmra.mxu1 %vm370_vm6, %v2259_v17  ;;  %v2368_v17 = vld [vmem:[%s2081_s5 + $0x28] sm:$0xf] }
  0xba   : > { %v1142_v28 = vshll.u32 %v2368_v17, 16  ;;  %v1146_v31 = vshrl.u32 %v2368_v17, 16  ;;  %v1140_v11 = vrot.slane %v1139_v62, 4  ;;  %v1225_v16 = vrot.slane %v2368_v17, 5 }
  0xbb   : > { %v1860_v17 = vrot.slane %v2365_v20, 9 }
  0xbc   : > { %v1144_v56 = vrot.slane %v1142_v28, 5  ;;  %v1148_v57 = vrot.slane %v1146_v31, 4  ;;  %v1227_v43 = vrot.slane %v1225_v16, 4 }
  0xbe   : > { %v2338_v54 = vpop.f32.mrf.mxu3  ;;  %1839 = vmatmul.msk.bf16.gmra.mxu2 %vm370_vm6, %v902_v10  ;;  %v1115_v10 = vor.u32 %v1114_v1, %v1111_v0  ;;  %v403_v13 = vpop.f32.mrf.mxu0  ;;  %v1149_v0 = vor.u32 %v1148_v57, %v1144_v56  ;;  %v1152_v1 = vshll.u32 %v1852_v58, 16  ;;  %v1145_v27 = vsel %vm2099_vm7, %v1140_v11, %v1144_v56 }
  0xbf   : > { %v459_v14 = vpop.f32.mrf.mxu1  ;;  %v1314_v52 = vunpack.c.l.b16 %v1145_v27  ;;  %v1226_v57 = vsel %vm2083_vm3, %v1860_v17, %v1225_v16  ;;  %v1229_v58 = vsel %vm2083_vm3, %v1227_v43, %v1228_v35  ;;  %v1863_v27 = vld [vmem:[%s2755_s1 + $0x14] sm:$0x3]  ;;  %v550_v17 = vadd.f32 %v2330_v48, %v2318_v44  ;;  %v1884_v35 = vld [vmem:[%s2755_s1 + $0x16] sm:$0x3] }
  0xc0   : > { %v2358_v30 = vadd.f32 %v459_v14, %v403_v13  ;;  %v1116_v15 = vrot.slane %v1115_v10, 4  ;;  %v1150_v12 = vrot.slane %v1149_v0, 4  ;;  %v1154_v13 = vrot.slane %v1152_v1, 5  ;;  %v2406_v14 = vld [vmem:[%s2081_s5 + $0x30] sm:$0xf] }
  0xc1   : > { %v2343_v59 = vpop.f32.mrf.mxu2  ;;  %v1160_v24 = vshll.u32 %v2406_v14, 16  ;;  %v547_v1 = vadd.f32 %v2310_v40, %v2308_v39  ;;  %v1337_v48 = vsel %vm383_vm0, %v1884_v35, 0 }
  0xc2   : > { %v1121_v23 = vsel %vm2099_vm7, %v1116_v15, %v1120_v4  ;;  %v1155_v28 = vsel %vm2099_vm7, %v1150_v12, %v1154_v13  ;;  %1346 = vmatpush.bf16.msrb.mxu1 %v1337_v48 }
  0xc3   : > { %1843 = vmatmul.msk.bf16.gmra.mxu3 %vm370_vm6, %v2250_v3  ;;  %v1312_v45 = vunpack.c.l.b16 %v1121_v23  ;;  %v1157_v23 = vshrl.u32 %v2406_v14, 16  ;;  %v1315_v56 = vunpack.c.l.b16 %v1155_v28  ;;  %v2452_v28 = vld [vmem:[%s2081_s5 + $0x40] sm:$0xf] }
  0xc4   : > { %v1239_v35 = vrot.slane %v2452_v28, 5 }
  0xc5   : > { %v2397_v51 = vpack.c.b16 %v1313_v46, %v1312_v45  ;;  %v1159_v45 = vrot.slane %v1157_v23, 4  ;;  %v1162_v46 = vrot.slane %v1160_v24, 5  ;;  %v1232_v23 = vrot.slane %v2410_v18, 5 }
  0xc6   : > { %v2351_v6 = vpop.f32.mrf.mxu3  ;;  %v406_v25 = vpop.f32.mrf.mxu0 }
  0xc7   : > { %v462_v32 = vpop.f32.mrf.mxu1  ;;  %v1163_v62 = vor.u32 %v1162_v46, %v1159_v45 }
  0xc9   : > { %v2356_v9 = vpop.f32.mrf.mxu2  ;;  %1829 = vmatmul.msk.bf16.gmra.mxu0 %vm370_vm6, %v2250_v3  ;;  %1833 = vmatmul.msk.bf16.gmra.mxu1 %vm370_vm6, %v2285_v34  ;;  %v1421_v34 = vunpack.c.l.b16 %v1222_v60  ;;  %v1172_v60 = vrot.slane %v1170_v2, 4  ;;  %v1164_v16 = vrot.slane %v1163_v62, 4  ;;  %v1861_v2 = vrot.slane %v2406_v14, 9 }
  0xcb   : > { %v1428_v15 = vpack.c.b16 %v1421_v34, %v1420_v5  ;;  %v1423_v34 = vunpack.c.l.b16 %v1229_v58 }
  0xce   : > { %v2360_v19 = vpop.f32.mrf.mxu3  ;;  %1840 = vmatmul.msk.bf16.gmra.mxu2 %vm370_vm6, %v2282_v33  ;;  %v2382_v33 = vadd.f32 %v462_v32, %v406_v25  ;;  %v408_v61 = vpop.f32.mrf.mxu0  ;;  %v1166_v32 = vshll.u32 %v2410_v18, 16 }
  0xcf   : > { %v464_v4 = vpop.f32.mrf.mxu1 }
  0xd0   : > { %v2399_v7 = vadd.f32 %v464_v4, %v408_v61  ;;  %v1168_v55 = vrot.slane %v1166_v32, 5  ;;  %v1855_v61 = vld [vmem:[%s2081_s5 + $0x38] sm:$0x1]  ;;  %v1422_v4 = vunpack.c.l.b16 %v1226_v57 }
  0xd1   : > { %v2370_v22 = vpop.f32.mrf.mxu2  ;;  %v1176_v12 = vshll.u32 %v1855_v61, 16  ;;  %v1235_v45 = vrot.slane %v1855_v61, 5  ;;  %v1233_v61 = vsel %vm2083_vm3, %v1861_v2, %v1232_v23 }
  0xd2   : > { %v1173_v11 = vor.u32 %v1172_v60, %v1168_v55  ;;  %v1429_v40 = vpack.c.b16 %v1423_v34, %v1422_v4  ;;  %v1169_v32 = vsel %vm2099_vm7, %v1164_v16, %v1168_v55  ;;  %v1858_v34 = vld [vmem:[%s2081_s5 + $0x44] sm:$0x1]  ;;  %v1424_v16 = vunpack.c.l.b16 %v1233_v61 }
  0xd3   : > { %1844 = vmatmul.msk.bf16.gmra.mxu3 %vm370_vm6, %v2278_v29  ;;  %v1316_v55 = vunpack.c.l.b16 %v1169_v32 }
  0xd4   : > { %v1174_v24 = vrot.slane %v1173_v11, 4 }
  0xd6   : > { %v2386_v47 = vpop.f32.mrf.mxu3  ;;  %v411_v25 = vpop.f32.mrf.mxu0 }
  0xd7   : > { %v467_v31 = vpop.f32.mrf.mxu1 }
  0xd8   : > { %v2424_v42 = vadd.f32 %v467_v31, %v411_v25  ;;  %v1178_v25 = vrot.slane %v1176_v12, 5  ;;  %v1271_v31 = vsel %vm383_vm0, %v1863_v27, 0 }
  0xd9   : > { %v2395_v3 = vpop.f32.mrf.mxu2  ;;  %1830 = vmatmul.msk.bf16.gmra.mxu0 %vm370_vm6, %v2278_v29  ;;  %1834 = vmatmul.msk.bf16.gmra.mxu1 %vm370_vm6, %v2298_v37  ;;  %v2438_v37 = vpack.c.b16 %v1315_v56, %v1314_v52  ;;  %v1190_v56 = vshll.u32 %v2452_v28, 16 }
  0xda   : > { %1280 = vmatpush.bf16.msrb.mxu0 %v1271_v31  ;;  %v1179_v14 = vsel %vm2099_vm7, %v1174_v24, %v1178_v25  ;;  %v1200_v24 = vshll.u32 %v1858_v34, 16 }
  0xdb   : > { %v1317_v58 = vunpack.c.l.b16 %v1179_v14  ;;  %v1192_v4 = vrot.slane %v1190_v56, 5  ;;  %v1241_v14 = vrot.slane %v1239_v35, 4 }
  0xdc   : > { %v1202_v2 = vrot.slane %v1200_v24, 5 }
  0xde   : > { %v2401_v10 = vpop.f32.mrf.mxu3  ;;  %1890 = vmatmul.msk.bf16.vlgmr.msrb.gmra.mxu2 %vm370_vm6, %v2397_v51  ;;  %v413_v0 = vpop.f32.mrf.mxu0 }
  0xdf   : > { %v469_v5 = vpop.f32.mrf.mxu1 }
  0xe0   : > { %v2440_v13 = vadd.f32 %v469_v5, %v413_v0 }
  0xe1   : > { %v862_v21 = vpop.f32.mrf.mxu2 }
  0xe2   : > { %v882_v38 = vadd.f32 %v862_v21, %v545_v26  ;;  %v2446_v26 = vld [vmem:[%s2081_s5 + $0x3c] sm:$0xf] }
  0xe3   : > { %1895 = vmatmul.msk.bf16.vlgmr.msrb.gmra.mxu3 %vm370_vm6, %v1428_v15  ;;  %v1181_v46 = vshrl.u32 %v2446_v26, 16  ;;  %v1184_v52 = vshll.u32 %v2446_v26, 16 }
  0xe5   : > { %v1183_v62 = vrot.slane %v1181_v46, 4  ;;  %v555_v46 = vadd.f32 %v2351_v6, %v2343_v59 }
  0xe6   : > { %v928_v49 = vpop.f32.mrf.mxu3  ;;  %v2461_v43 = vpop.f32.mrf.mxu0 }
  0xe7   : > { %v948_v20 = vadd.f32 %v928_v49, %v882_v38  ;;  %v1234_v38 = vrot.slane %v1232_v23, 4  ;;  %v2467_v44 = vpop.f32.mrf.mxu1  ;;  %v1918_v49 = vld [vmem:[%s2081_s5 + $0x18] sm:$0xff] }
  0xe9   : > { %1493 = vrot.lane.b32.xlu0 %v948_v20, %s2005_s7  ;;  %v864_v29 = vpop.f32.mrf.mxu2  ;;  %v1194_v20 = vshrl.u32 %v2452_v28, 16  ;;  %1880 = vmatmul.msk.bf16.vlgmr.msrb.gmra.mxu0 %vm370_vm6, %v1918_v49  ;;  %v1862_v28 = vrot.slane %v2446_v26, 9 }
  0xea   : > { %v883_v15 = vadd.f32 %v864_v29, %v547_v1  ;;  %v1236_v29 = vsel %vm2083_vm3, %v1234_v38, %v1235_v45  ;;  %1885 = vmatmul.msk.bf16.vlgmr.msrb.gmra.mxu1 %vm370_vm6, %v2397_v51  ;;  %v1186_v1 = vrot.slane %v1184_v52, 5  ;;  %v1242_v52 = vrot.slane %v1858_v34, 5 }
  0xeb   : > { %v1196_v5 = vrot.slane %v1194_v20, 4  ;;  %v1240_v6 = vsel %vm2083_vm3, %v1862_v28, %v1239_v35 }
  0xec   : > { %v1187_v51 = vor.u32 %v1186_v1, %v1183_v62  ;;  %v1243_v36 = vsel %vm2083_vm3, %v1241_v14, %v1242_v52 }
  0xed   : > { %v1427_v62 = vunpack.c.l.b16 %v1243_v36 }
  0xee   : > { %v930_v21 = vpop.f32.mrf.mxu3  ;;  %1891 = vmatmul.msk.bf16.gmra.mxu2 %vm370_vm6, %v2438_v37  ;;  %v2486_v12 = vpop.f32.mrf.mxu0 }
  0xef   : > { %v949_v39 = vadd.f32 %v930_v21, %v883_v15  ;;  %v1322_v15 = vpack.c.b16 %v1317_v58, %v1316_v55  ;;  %v1425_v21 = vunpack.c.l.b16 %v1236_v29  ;;  %v2488_v23 = vpop.f32.mrf.mxu1  ;;  %v557_v29 = vadd.f32 %v2360_v19, %v2356_v9 }
  0xf1   : > { %1495 = vrot.lane.b32.xlu0 %v949_v39, %s2005_s7  ;;  %v867_v18 = vpop.f32.mrf.mxu2  ;;  %v552_v39 = vadd.f32 %v2338_v54, %v2334_v50  ;;  %v1430_v31 = vpack.c.b16 %v1425_v21, %v1424_v16  ;;  %v1919_v50 = vld [vmem:[%s2081_s5 + $0x24] sm:$0xff]  ;;  %v560_v21 = vadd.f32 %v2386_v47, %v2370_v22  ;;  %v562_v22 = vadd.f32 %v2401_v10, %v2395_v3 }
  0xf2   : > { %v884_v57 = vadd.f32 %v867_v18, %v550_v17  ;;  %v1188_v18 = vrot.slane %v1187_v51, 4 }
  0xf3   : > { %1896 = vmatmul.msk.bf16.gmra.mxu3 %vm370_vm6, %v1429_v40  ;;  %v1197_v40 = vor.u32 %v1196_v5, %v1192_v4 }
  0xf4   : > { %v1193_v48 = vsel %vm2099_vm7, %v1188_v18, %v1192_v4 }
  0xf5   : > { %v1198_v32 = vrot.slane %v1197_v40, 4 }
  0xf6   : > { %v933_v60 = vpop.f32.mrf.mxu3  ;;  %v2495_v45 = vpop.f32.mrf.mxu0 }
  0xf7   : > { %v950_v0 = vadd.f32 %v933_v60, %v884_v57  ;;  %v2498_v54 = vpop.f32.mrf.mxu1  ;;  %v1203_v49 = vsel %vm2099_vm7, %v1198_v32, %v1202_v2  ;;  %v1318_v57 = vunpack.c.l.b16 %v1193_v48 }
  0xf8   : > { %v1319_v55 = vunpack.c.l.b16 %v1203_v49 }
  0xf9   : > { %1497 = vrot.lane.b32.xlu1 %v950_v0, %s2005_s7  ;;  %v869_v11 = vpop.f32.mrf.mxu2  ;;  %1881 = vmatmul.msk.bf16.gmra.mxu0 %vm370_vm6, %v1919_v50 }
  0xfa   : > { %v885_v25 = vadd.f32 %v869_v11, %v552_v39  ;;  %1886 = vmatmul.msk.bf16.gmra.mxu1 %vm370_vm6, %v2438_v37  ;;  %v1323_v58 = vpack.c.b16 %v1319_v55, %v1318_v57  ;;  %v1426_v37 = vunpack.c.l.b16 %v1240_v6  ;;  %v1920_v11 = vld [vmem:[%s2081_s5 + $0x30] sm:$0xff] }
  0xfc   : > { %v1431_v4 = vpack.c.b16 %v1427_v62, %v1426_v37 }
  0xfe   : > { %v935_v27 = vpop.f32.mrf.mxu3  ;;  %1892 = vmatmul.msk.bf16.gmra.mxu2 %vm370_vm6, %v1322_v15  ;;  %v2516_v60 = vpop.f32.mrf.mxu0 }
  0xff   : > { %v951_v17 = vadd.f32 %v935_v27, %v885_v25  ;;  %v2518_v61 = vpop.f32.mrf.mxu1 }
 0x101   : > { %1499 = vrot.lane.b32.xlu1 %v951_v17, %s2005_s7  ;;  %v872_v38 = vpop.f32.mrf.mxu2 }
 0x102   : > { %v886_v56 = vadd.f32 %v872_v38, %v555_v46 }
 0x103   : > { %1897 = vmatmul.msk.bf16.gmra.mxu3 %vm370_vm6, %v1430_v31 }
 0x106   : > { %v938_v20 = vpop.f32.mrf.mxu3  ;;  %v2524_v34 = vpop.f32.mrf.mxu0 }
 0x107   : > { %v952_v59 = vadd.f32 %v938_v20, %v886_v56  ;;  %v2527_v16 = vpop.f32.mrf.mxu1 }
 0x109   : > { %1501 = vrot.lane.b32.xlu2 %v952_v59, %s2005_s7  ;;  %v874_v26 = vpop.f32.mrf.mxu2  ;;  %1882 = vmatmul.msk.bf16.gmra.mxu0 %vm370_vm6, %v1920_v11  ;;  %v2602_v11 = vld [vmem:[%s2756_s2] ss:$0 sm:$0xff] }
 0x10a   : > { %v887_v0 = vadd.f32 %v874_v26, %v557_v29  ;;  %1887 = vmatmul.msk.bf16.gmra.mxu1 %vm370_vm6, %v1322_v15  ;;  %v1921_v15 = vld [vmem:[%s2081_s5 + $0x3c] sm:$0xff]  ;;  %s1725_s5 = sshll.u32 %s1987_s12, 2 }
 0x10b   : > { %p188_p6 = scmp.lt.s32.totalorder %s1725_s5, 15 }
 0x10d   : > { %s2775_s5 = smov (!%p188_p6, %s1725_s5), 15 }
 0x10e   : > { %v940_v1 = vpop.f32.mrf.mxu3  ;;  %1893 = vmatmul.msk.bf16.gmra.mxu2 %vm370_vm6, %v1323_v58  ;;  %v2535_v40 = vpop.f32.mrf.mxu0  ;;  %s1726_s19 = sshll.u32 %s2775_s5, 2 }
 0x10f   : > { %v953_v8 = vadd.f32 %v940_v1, %v887_v0  ;;  %v2537_v24 = vpop.f32.mrf.mxu1  ;;  %s192_s12 = sadd.s32 %s1727_s20, %s1726_s19 }
 0x110   : > { %s1728_s23 = sshll.u32 %s192_s12, 3 }
 0x111   : > { %1503 = vrot.lane.b32.xlu2 %v953_v8, %s2005_s7  ;;  %v877_v5 = vpop.f32.mrf.mxu2  ;;  %v774_v8 = vadd.f32 %v2461_v43, %v2326_v41  ;;  %s2616_s25 = scalar_lea.vmem %s2757_s3, %s1728_s23 }
 0x112   : > { %v888_v9 = vadd.f32 %v877_v5, %v560_v21 }
 0x113   : > { %1898 = vmatmul.msk.bf16.gmra.mxu3 %vm370_vm6, %v1431_v4  ;;  %v840_v21 = vadd.f32 %v2467_v44, %v774_v8 }
 0x116   : > { %v943_v19 = vpop.f32.mrf.mxu3  ;;  %v2544_v17 = vpop.f32.mrf.mxu0 }
 0x117   : > { %v954_v39 = vadd.f32 %v943_v19, %v888_v9  ;;  %v2547_v18 = vpop.f32.mrf.mxu1 }
 0x119   : > { %1505 = vrot.lane.b32.xlu0 %v954_v39, %s2005_s7  ;;  %v879_v51 = vpop.f32.mrf.mxu2  ;;  %1883 = vmatmul.msk.bf16.gmra.mxu0 %vm370_vm6, %v1921_v15 }
 0x11a   : > { %v889_v47 = vadd.f32 %v879_v51, %v562_v22  ;;  %1888 = vmatmul.msk.bf16.gmra.mxu1 %vm370_vm6, %v1323_v58  ;;  %v775_v22 = vadd.f32 %v2486_v12, %v2336_v53 }
 0x11c   : > { %v841_v15 = vadd.f32 %v2488_v23, %v775_v22 }
 0x11e   : > { %v945_v25 = vpop.f32.mrf.mxu3  ;;  %v2553_v3 = vpop.f32.mrf.mxu0 }
 0x11f   : > { %v955_v27 = vadd.f32 %v945_v25, %v889_v47  ;;  %v2555_v10 = vpop.f32.mrf.mxu1  ;;  %v778_v47 = vadd.f32 %v2524_v34, %v2382_v33 }
 0x121   : > { %1507 = vrot.lane.b32.xlu1 %v955_v27, %s2005_s7  ;;  %v2542_v31 = vpop.f32.mrf.mxu2  ;;  %v844_v53 = vadd.f32 %v2527_v16, %v778_v47  ;;  %v776_v16 = vadd.f32 %v2495_v45, %v2347_v63 }
 0x126   : > { %v1072_v32 = vpop.f32.mrf.mxu3  ;;  %v2561_v50 = vpop.f32.mrf.mxu0 }
 0x127   : > { %v2563_v46 = vpop.f32.mrf.mxu1  ;;  %v1073_v33 = vadd.f32 %v1072_v32, %v2542_v31  ;;  %v779_v31 = vadd.f32 %v2535_v40, %v2399_v7 }
 0x129   : > { %v2551_v2 = vpop.f32.mrf.mxu2 }
 0x12e   : > { %v2557_v35 = vpop.f32.mrf.mxu3  ;;  %v974_v28 = vpop.f32.mrf.mxu0 }
 0x12f   : > { %v1006_v14 = vpop.f32.mrf.mxu1  ;;  %v1075_v63 = vadd.f32 %v2557_v35, %v2551_v2  ;;  %v777_v2 = vadd.f32 %v2516_v60, %v2358_v30 }
 0x130   : > { %v2569_v52 = vadd.f32 %v1006_v14, %v974_v28 }
 0x131   : > { %v2559_v38 = vpop.f32.mrf.mxu2 }
 0x136   : > { %v2565_v48 = vpop.f32.mrf.mxu3  ;;  %v977_v57 = vpop.f32.mrf.mxu0 }
 0x137   : > { %v1009_v55 = vpop.f32.mrf.mxu1 }
 0x138   : > { %v2575_v59 = vadd.f32 %v1009_v55, %v977_v57 }
 0x139   : > { %v2567_v49 = vpop.f32.mrf.mxu2 }
 0x13e   : > { %v2571_v56 = vpop.f32.mrf.mxu3  ;;  %v2582_v26 = vpop.f32.mrf.mxu0 }
 0x13f   : > { %v2584_v58 = vpop.f32.mrf.mxu1 }
 0x141   : > { %v2573_v20 = vpop.f32.mrf.mxu2 }
 0x146   : > { %v2577_v6 = vpop.f32.mrf.mxu3  ;;  %v982_v62 = vpop.f32.mrf.mxu0 }
 0x147   : > { %v1014_v0 = vpop.f32.mrf.mxu1 }
 0x148   : > { %v2590_v1 = vadd.f32 %v1014_v0, %v982_v62 }
 0x149   : > { %v2579_v36 = vpop.f32.mrf.mxu2 }
 0x14e   : > { %v2586_v29 = vpop.f32.mrf.mxu3  ;;  %v984_v9 = vpop.f32.mrf.mxu0 }
 0x14f   : > { %v1016_v39 = vpop.f32.mrf.mxu1 }
 0x150   : > { %v2606_v41 = vadd.f32 %v1016_v39, %v984_v9  ;;  %v842_v39 = vadd.f32 %v2498_v54, %v776_v16 }
 0x151   : > { %v2588_v37 = vpop.f32.mrf.mxu2 }
 0x156   : > { %v2595_v4 = vpop.f32.mrf.mxu3  ;;  %v2624_v12 = vpop.f32.mrf.mxu0 }
 0x157   : > { %v2629_v55 = vpop.f32.mrf.mxu1 }
 0x159   : > { %v2597_v5 = vpop.f32.mrf.mxu2 }
 0x15b   : > { %v1494_v19 = vpop.permute.xlu0 %1493 }
 0x15c   : > { %v1518_v51 = vsel %vm1517_vm8, %v840_v21, %v1494_v19 }
 0x15d   : > { %v1529_v43 = vadd.f32 %v2602_v11, %v1518_v51  ;;  %v845_v51 = vadd.f32 %v2537_v24, %v779_v31 }
 0x15e   : > { %v2618_v44 = vpop.f32.mrf.mxu3  ;;  %v989_v22 = vpop.f32.mrf.mxu0 }
 0x15f   : > { %v1537_v25 = vmax.f32 %v1529_v43, 0.0  ;;  %v1021_v47 = vpop.f32.mrf.mxu1 }
 0x161   : > { %1546 = vst.msk [vmem:[%s2616_s25] sm:$0xff] %vm1545_vm9, %v1537_v25  ;;  %v1390_v27 = vpop.f32.mrf.mxu2 }
 0x162   : > { %v1410_v62 = vadd.f32 %v1390_v27, %v1073_v33  ;;  %v2650_v27 = vadd.f32 %v1021_v47, %v989_v22 }
 0x163   : > { %v1502_v34 = vpop.permute.xlu2 %1501  ;;  %v1496_v28 = vpop.permute.xlu0 %1495 }
 0x164   : > { %v1522_v14 = vsel %vm1517_vm8, %v844_v53, %v1502_v34  ;;  %v1519_v57 = vsel %vm1517_vm8, %v841_v15, %v1496_v28  ;;  %v843_v28 = vadd.f32 %v2518_v61, %v777_v2  ;;  %v1080_v61 = vadd.f32 %v2571_v56, %v2567_v49 }
 0x165   : > { %v1533_v0 = vadd.f32 %v2602_v11, %v1522_v14  ;;  %v1530_v23 = vadd.f32 %v2602_v11, %v1519_v57  ;;  %v1078_v14 = vadd.f32 %v2565_v48, %v2559_v38  ;;  %v1085_v56 = vadd.f32 %v2586_v29, %v2579_v36 }
 0x166   : > { %v1456_v32 = vpop.f32.mrf.mxu3  ;;  %v1088_v29 = vadd.f32 %v2595_v4, %v2588_v37  ;;  %v1282_v4 = vpop.f32.mrf.mxu0 }
 0x167   : > { %v1541_v8 = vmax.f32 %v1533_v0, 0.0  ;;  %v1538_v21 = vmax.f32 %v1530_v23, 0.0  ;;  %v1476_v9 = vadd.f32 %v1456_v32, %v1410_v62 }
 0x169   : > { %1550 = vst.msk [vmem:[%s2616_s25 + $0x40] sm:$0xff] %vm1545_vm9, %v1541_v8  ;;  %1562 = vrot.lane.b32.xlu2 %v1476_v9, %s2005_s7  ;;  %v1392_v19 = vpop.f32.mrf.mxu2 }
 0x16a   : > { %1547 = vst.msk [vmem:[%s2616_s25 + $0x8] sm:$0xff] %vm1545_vm9, %v1538_v21  ;;  %v1411_v25 = vadd.f32 %v1392_v19, %v1075_v63  ;;  %v1083_v21 = vadd.f32 %v2577_v6, %v2573_v20  ;;  %v780_v19 = vadd.f32 %v2544_v17, %v2424_v42  ;;  %v781_v6 = vadd.f32 %v2553_v3, %v2440_v13 }
 0x16b   : > { %v1504_v7 = vpop.permute.xlu2 %1503  ;;  %v1498_v45 = vpop.permute.xlu1 %1497 }
 0x16c   : > { %v1523_v40 = vsel %vm1517_vm8, %v845_v51, %v1504_v7  ;;  %v1520_v43 = vsel %vm1517_vm8, %v842_v39, %v1498_v45  ;;  %v846_v49 = vadd.f32 %v2547_v18, %v780_v19  ;;  %v847_v36 = vadd.f32 %v2555_v10, %v781_v6 }
 0x16d   : > { %v1534_v54 = vadd.f32 %v2602_v11, %v1523_v40  ;;  %v1531_v24 = vadd.f32 %v2602_v11, %v1520_v43  ;;  %v1090_v10 = vadd.f32 %v2618_v44, %v2597_v5 }
 0x16e   : > { %v1458_v35 = vpop.f32.mrf.mxu3 }
 0x16f   : > { %v1542_v15 = vmax.f32 %v1534_v54, 0.0  ;;  %v1539_v53 = vmax.f32 %v1531_v24, 0.0  ;;  %v1477_v33 = vadd.f32 %v1458_v35, %v1411_v25 }
 0x171   : > { %1551 = vst.msk [vmem:[%s2616_s25 + $0x48] sm:$0xff] %vm1545_vm9, %v1542_v15  ;;  %1564 = vrot.lane.b32.xlu0 %v1477_v33, %s2005_s7  ;;  %v1395_v34 = vpop.f32.mrf.mxu2  ;;  %v1005_v33 = vadd.f32 %v2563_v46, %v2561_v50 }
 0x172   : > { %1548 = vst.msk [vmem:[%s2616_s25 + $0x20] sm:$0xff] %vm1545_vm9, %v1539_v53  ;;  %v1412_v60 = vadd.f32 %v1395_v34, %v1078_v14  ;;  %v1348_v53 = vpop.f32.mrf.mxu1  ;;  %v1284_v34 = vpop.f32.mrf.mxu0 }
 0x173   : > { %v1500_v57 = vpop.permute.xlu1 %1499 }
 0x174   : > { %v1521_v30 = vsel %vm1517_vm8, %v843_v28, %v1500_v57  ;;  %v1302_v28 = vadd.f32 %v1282_v4, %v1005_v33 }
 0x175   : > { %v1532_v62 = vadd.f32 %v2602_v11, %v1521_v30 }
 0x176   : > { %v1461_v0 = vpop.f32.mrf.mxu3  ;;  %v1368_v57 = vadd.f32 %v1348_v53, %v1302_v28 }
 0x177   : > { %v1540_v23 = vmax.f32 %v1532_v62, 0.0  ;;  %v1478_v16 = vadd.f32 %v1461_v0, %v1412_v60 }
 0x179   : > { %1549 = vst.msk [vmem:[%s2616_s25 + $0x28] sm:$0xff] %vm1545_vm9, %v1540_v23  ;;  %1566 = vrot.lane.b32.xlu1 %v1478_v16, %s2005_s7  ;;  %v1397_v31 = vpop.f32.mrf.mxu2  ;;  %v1012_v16 = vadd.f32 %v2584_v58, %v2582_v26 }
 0x17a   : > { %v1413_v32 = vadd.f32 %v1397_v31, %v1080_v61  ;;  %v1350_v14 = vpop.f32.mrf.mxu1  ;;  %v1287_v62 = vpop.f32.mrf.mxu0 }
 0x17e   : > { %v1463_v8 = vpop.f32.mrf.mxu3 }
 0x17f   : > { %v1479_v38 = vadd.f32 %v1463_v8, %v1413_v32 }
 0x181   : > { %1568 = vrot.lane.b32.xlu2 %v1479_v38, %s2005_s7  ;;  %v1400_v48 = vpop.f32.mrf.mxu2 }
 0x182   : > { %v1414_v9 = vadd.f32 %v1400_v48, %v1083_v21  ;;  %v1353_v0 = vpop.f32.mrf.mxu1  ;;  %v1289_v23 = vpop.f32.mrf.mxu0  ;;  %v1303_v21 = vadd.f32 %v1284_v34, %v2569_v52  ;;  %v1020_v52 = vadd.f32 %v2629_v55, %v2624_v12 }
 0x183   : > { %v1305_v46 = vadd.f32 %v1289_v23, %v1012_v16 }
 0x184   : > { %v1369_v19 = vadd.f32 %v1350_v14, %v1303_v21 }
 0x186   : > { %v1466_v39 = vpop.f32.mrf.mxu3 }
 0x187   : > { %v1480_v51 = vadd.f32 %v1466_v39, %v1414_v9 }
 0x189   : > { %1570 = vrot.lane.b32.xlu0 %v1480_v51, %s2005_s7  ;;  %v1402_v63 = vpop.f32.mrf.mxu2 }
 0x18a   : > { %v1415_v40 = vadd.f32 %v1402_v63, %v1085_v56  ;;  %v1355_v50 = vpop.f32.mrf.mxu1  ;;  %v1292_v31 = vpop.f32.mrf.mxu0  ;;  %v1304_v63 = vadd.f32 %v1287_v62, %v2575_v59 }
 0x18b   : > { %v1506_v7 = vpop.permute.xlu0 %1505  ;;  %v1371_v61 = vadd.f32 %v1355_v50, %v1305_v46  ;;  %v1306_v55 = vadd.f32 %v1292_v31, %v2590_v1 }
 0x18c   : > { %v1524_v45 = vsel %vm1517_vm8, %v846_v49, %v1506_v7  ;;  %v1370_v7 = vadd.f32 %v1353_v0, %v1304_v63 }
 0x18d   : > { %v1535_v20 = vadd.f32 %v2602_v11, %v1524_v45 }
 0x18e   : > { %v1468_v42 = vpop.f32.mrf.mxu3 }
 0x18f   : > { %v1543_v17 = vmax.f32 %v1535_v20, 0.0  ;;  %v1481_v43 = vadd.f32 %v1468_v42, %v1415_v40 }
 0x191   : > { %1552 = vst.msk [vmem:[%s2616_s25 + $0x60] sm:$0xff] %vm1545_vm9, %v1543_v17  ;;  %1572 = vrot.lane.b32.xlu1 %v1481_v43, %s2005_s7  ;;  %v1405_v18 = vpop.f32.mrf.mxu2 }
 0x192   : > { %v1416_v25 = vadd.f32 %v1405_v18, %v1088_v29  ;;  %v1358_v38 = vpop.f32.mrf.mxu1  ;;  %v1294_v39 = vpop.f32.mrf.mxu0 }
 0x193   : > { %v1508_v22 = vpop.permute.xlu1 %1507 }
 0x194   : > { %v1525_v47 = vsel %vm1517_vm8, %v847_v36, %v1508_v22  ;;  %v1372_v22 = vadd.f32 %v1358_v38, %v1306_v55 }
 0x195   : > { %v1536_v13 = vadd.f32 %v2602_v11, %v1525_v47 }
 0x196   : > { %v1471_v3 = vpop.f32.mrf.mxu3 }
 0x197   : > { %v1544_v54 = vmax.f32 %v1536_v13, 0.0  ;;  %v1482_v24 = vadd.f32 %v1471_v3, %v1416_v25  ;;  %v1307_v3 = vadd.f32 %v1294_v39, %v2606_v41 }
 0x199   : > { %1553 = vst.msk [vmem:[%s2616_s25 + $0x68] sm:$0xff] %vm1545_vm9, %v1544_v54  ;;  %1574 = vrot.lane.b32.xlu2 %v1482_v24, %s2005_s7  ;;  %v1407_v2 = vpop.f32.mrf.mxu2 }
 0x19a   : > { %v1417_v35 = vadd.f32 %v1407_v2, %v1090_v10  ;;  %v1360_v49 = vpop.f32.mrf.mxu1  ;;  %v1297_v20 = vpop.f32.mrf.mxu0 }
 0x19b   : > { %v1308_v42 = vadd.f32 %v1297_v20, %v1020_v52  ;;  %v1373_v24 = vadd.f32 %v1360_v49, %v1307_v3 }
 0x19e   : > { %v1473_v15 = vpop.f32.mrf.mxu3 }
 0x19f   : > { %v1483_v37 = vadd.f32 %v1473_v15, %v1417_v35 }
 0x1a1   : > { %1576 = vrot.lane.b32.xlu0 %v1483_v37, %s2005_s7 }
 0x1a2   : > { %v1363_v43 = vpop.f32.mrf.mxu1  ;;  %v1299_v15 = vpop.f32.mrf.mxu0 }
 0x1a3   : > { %v1374_v59 = vadd.f32 %v1363_v43, %v1308_v42  ;;  %v1309_v37 = vadd.f32 %v1299_v15, %v2650_v27 }
 0x1aa   : > { %v1365_v4 = vpop.f32.mrf.mxu1 }
 0x1ab   : > { %v1375_v53 = vadd.f32 %v1365_v4, %v1309_v37 }
 0x1c3   : > { %v1563_v30 = vpop.permute.xlu2 %1562 }
 0x1c4   : > { %v1586_v60 = vsel %vm1517_vm8, %v1368_v57, %v1563_v30 }
 0x1c5   : > { %v1594_v5 = vadd.f32 %v2602_v11, %v1586_v60 }
 0x1c7   : > { %v1602_v44 = vmax.f32 %v1594_v5, 0.0 }
 0x1c9   : > { %1899 = vst.msk [vmem:[%s2616_s25 + $0x10] sm:$0xff] %vm1545_vm9, %v1602_v44 }
 0x1db   : > { %v1569_v32 = vpop.permute.xlu2 %1568 }
 0x1dc   : > { %v1589_v8 = vsel %vm1517_vm8, %v1371_v61, %v1569_v32 }
 0x1dd   : > { %v1597_v48 = vadd.f32 %v2602_v11, %v1589_v8 }
 0x1df   : > { %v1605_v9 = vmax.f32 %v1597_v48, 0.0 }
 0x1e1   : > { %1902 = vst.msk [vmem:[%s2616_s25 + $0x38] sm:$0xff] %vm1545_vm9, %v1605_v9 }
 0x1e3   : > { %v1565_v51 = vpop.permute.xlu0 %1564 }
 0x1e4   : > { %v1587_v26 = vsel %vm1517_vm8, %v1369_v19, %v1565_v51 }
 0x1e5   : > { %v1595_v58 = vadd.f32 %v2602_v11, %v1587_v26 }
 0x1e7   : > { %v1603_v56 = vmax.f32 %v1595_v58, 0.0 }
 0x1e9   : > { %1900 = vst.msk [vmem:[%s2616_s25 + $0x18] sm:$0xff] %vm1545_vm9, %v1603_v56 }
 0x1eb   : > { %v1567_v45 = vpop.permute.xlu1 %1566 }
 0x1ec   : > { %v1588_v40 = vsel %vm1517_vm8, %v1370_v7, %v1567_v45 }
 0x1ed   : > { %v1596_v6 = vadd.f32 %v2602_v11, %v1588_v40 }
 0x1ef   : > { %v1604_v17 = vmax.f32 %v1596_v6, 0.0 }
 0x1f1   : > { %1901 = vst.msk [vmem:[%s2616_s25 + $0x30] sm:$0xff] %vm1545_vm9, %v1604_v17 }
 0x1f3   : > { %v1575_v18 = vpop.permute.xlu2 %1574 }
 0x1f4   : > { %v1592_v36 = vsel %vm1517_vm8, %v1374_v59, %v1575_v18 }
 0x1f5   : > { %v1600_v12 = vadd.f32 %v2602_v11, %v1592_v36 }
 0x1f7   : > { %v1608_v29 = vmax.f32 %v1600_v12, 0.0 }
 0x1f9   : > { %1905 = vst.msk [vmem:[%s2616_s25 + $0x70] sm:$0xff] %vm1545_vm9, %v1608_v29 }
 0x1fb   : > { %v1571_v47 = vpop.permute.xlu0 %1570 }
 0x1fc   : > { %v1590_v25 = vsel %vm1517_vm8, %v1372_v22, %v1571_v47 }
 0x1fd   : > { %v1598_v13 = vadd.f32 %v2602_v11, %v1590_v25 }
 0x1ff   : > { %v1606_v54 = vmax.f32 %v1598_v13, 0.0 }
 0x201   : > { %1903 = vst.msk [vmem:[%s2616_s25 + $0x50] sm:$0xff] %vm1545_vm9, %v1606_v54 }
 0x203   : > { %v1573_v2 = vpop.permute.xlu1 %1572 }
 0x204   : > { %v1591_v10 = vsel %vm1517_vm8, %v1373_v24, %v1573_v2 }
 0x205   : > { %v1599_v1 = vadd.f32 %v2602_v11, %v1591_v10 }
 0x207   : > { %v1607_v35 = vmax.f32 %v1599_v1, 0.0 }
 0x209   : > { %1904 = vst.msk [vmem:[%s2616_s25 + $0x58] sm:$0xff] %vm1545_vm9, %v1607_v35 }
 0x213   : > { %v1577_v33 = vpop.permute.xlu0 %1576 }
 0x214   : > { %v1593_v41 = vsel %vm1517_vm8, %v1375_v53, %v1577_v33 }
 0x215   : > { %v1601_v34 = vadd.f32 %v2602_v11, %v1593_v41 }
 0x217   : > { %v1609_v28 = vmax.f32 %v1601_v34, 0.0 }
 0x219   : > { %1906 = vst.msk [vmem:[%s2616_s25 + $0x78] sm:$0xff] %vm1545_vm9, %v1609_v28 }
 0x21a PF: > { %s13_s16 = sadd.s32 1, %s2003_s16   ;;  %s2762_s12 = smov %s1995_s14 }
 0x21b   : > { %p10_p7 = scmp.ge.s32.totalorder %s13_s16, 10   ;;  %s2763_s13 = smov %s1999_s15 }
 0x21c   : > { %s2764_s14 = smov %s2767_s17  ;;  %s2765_s15 = smov %s2771_s18 }
 0x21d   :  { %12 = sbr.rel (!%p10_p7) target bundleno = 3 (0x3), region = 81 }

</bundles_post_ra>
